<compile_context>
chip_gen: v7x
topology: tpu7x:2x2x1
jax: 0.10.0
libtpu: 0.0.40
codegen_flags: <defaults>
</compile_context>

<pallas_src>
import jax
import jax.numpy as jnp
from jax import lax
from jax.experimental import pallas as pl
from jax.experimental.pallas import tpu as pltpu


def _round_up(x, m):
    return (x + m - 1) // m * m


def _pad_gates(w, H, H_pad, axis=0):
    """Pad each torch gate segment (r, z, n) along `axis` from H to H_pad with zeros."""
    if H_pad == H:
        return w
    parts = []
    for g in range(3):
        seg = lax.slice_in_dim(w, g * H, (g + 1) * H, axis=axis)
        pad = [(0, 0)] * w.ndim
        pad[axis] = (0, H_pad - H)
        parts.append(jnp.pad(seg, pad))
    return jnp.concatenate(parts, axis=axis)


# --------------------------------------------------------------------------------------
# Pallas kernel: the serial bidirectional GRU recurrence over a time block of Tt steps.
# --------------------------------------------------------------------------------------
def _bigru_recurrence_kernel(len_ref,             # (Bp, 1) int32
                             gxf_ref, gxb_ref,    # (Tt, Bp, 3Hp) f32  (fwd / bwd gates)
                             whh_ref,             # (2, Hp, 3Hp) bf16  [fwd, bwd]
                             bhh_ref,             # (2, 1, 3Hp)  f32   [fwd, bwd]
                             h0_ref,              # (2, Bp, Hp)  f32   [fwd, bwd]
                             out_ref,             # (2, Bp, Hp)  f32: [backward, forward]
                             hf_scr, hb_scr):     # (Bp, Hp) f32 persistent state
    i = pl.program_id(0)
    nb = pl.num_programs(0)
    Tt = gxf_ref.shape[0]
    Hp = hf_scr.shape[-1]
    T_total = nb * Tt

    @pl.when(i == 0)
    def _():
        hf_scr[...] = h0_ref[0]
        hb_scr[...] = h0_ref[1]

    lengths = len_ref[...]                  # (Bp, 1) int32
    whh_f = whh_ref[0]                      # (Hp, 3Hp) bf16, loop invariant
    whh_b = whh_ref[1]
    bhh_f = bhh_ref[0]                      # (1, 3Hp) f32
    bhh_b = bhh_ref[1]

    def gru_cell(gx, h, whh_t, bhh):
        # gx already contains x @ W_ih^T + b_ih (hoisted out of the kernel).
        gh = jnp.dot(h.astype(jnp.bfloat16), whh_t,
                     preferred_element_type=jnp.float32) + bhh
        r = jax.nn.sigmoid(gx[:, 0:Hp] + gh[:, 0:Hp])
        z = jax.nn.sigmoid(gx[:, Hp:2 * Hp] + gh[:, Hp:2 * Hp])
        n = jnp.tanh(gx[:, 2 * Hp:3 * Hp] + r * gh[:, 2 * Hp:3 * Hp])
        return n + z * (h - n)              # == (1-z)*n + z*h

    def body(s, carry):
        hf, hb = carry
        t_f = i * Tt + s                    # global forward timestep
        t_b = T_total - 1 - t_f             # global backward timestep
        hf_new = gru_cell(gxf_ref[s], hf, whh_f, bhh_f)
        hb_new = gru_cell(gxb_ref[Tt - 1 - s], hb, whh_b, bhh_b)
        # pack_padded_sequence semantics: padded timesteps do not update the state.
        hf = jnp.where(t_f < lengths, hf_new, hf)
        hb = jnp.where(t_b < lengths, hb_new, hb)
        return hf, hb

    hf, hb = lax.fori_loop(0, Tt, body, (hf_scr[...], hb_scr[...]), unroll=True)
    hf_scr[...] = hf
    hb_scr[...] = hb

    @pl.when(i == nb - 1)
    def _():
        out_ref[0] = hb                     # lstm_output[-1]  (backward final hidden)
        out_ref[1] = hf                     # lstm_output[-2]  (forward final hidden)


# --------------------------------------------------------------------------------------
# Wrapper: padding, hoisted input projection, pallas_call.
# --------------------------------------------------------------------------------------
def bigru_encoder_pallas(sentences_btd, sentence_length, params, topic_vectors=None,
                         *, time_block=8):
    """Bidirectional-GRU encoder. Returns (B, 2H) = concat(h_backward, h_forward)."""
    B, T, D = sentences_btd.shape
    H = params["whh_f"].shape[1]            # torch W_hh layout: (3H, H)

    f32, bf16 = jnp.float32, jnp.bfloat16
    H_pad = _round_up(H, 128)
    B_pad = _round_up(B, 8)
    Tt = int(time_block)
    T_pad = _round_up(T, Tt)
    nb = T_pad // Tt
    G = 3 * H_pad

    # ---- lane-align the gate layout: pad each (r,z,n) slab from H to H_pad --------
    wih_f = _pad_gates(params["wih_f"].astype(f32), H, H_pad, axis=0)           # (3Hp, D)
    wih_b = _pad_gates(params["wih_b"].astype(f32), H, H_pad, axis=0)
    whh_f = _pad_gates(jnp.pad(params["whh_f"].astype(f32), ((0, 0), (0, H_pad - H))),
                       H, H_pad, axis=0)                                        # (3Hp, Hp)
    whh_b = _pad_gates(jnp.pad(params["whh_b"].astype(f32), ((0, 0), (0, H_pad - H))),
                       H, H_pad, axis=0)
    bih_f = _pad_gates(params["bih_f"].astype(f32), H, H_pad, axis=0)           # (3Hp,)
    bih_b = _pad_gates(params["bih_b"].astype(f32), H, H_pad, axis=0)
    bhh_f = _pad_gates(params["bhh_f"].astype(f32), H, H_pad, axis=0).reshape(1, G)
    bhh_b = _pad_gates(params["bhh_b"].astype(f32), H, H_pad, axis=0).reshape(1, G)

    # ---- pad activations: (B, T, D) batch-first -> time-major (T_pad, B_pad, D) ---
    x = jnp.transpose(sentences_btd.astype(f32), (1, 0, 2))                     # (T, B, D)
    x = jnp.pad(x, ((0, T_pad - T), (0, B_pad - B), (0, 0)))
    lengths = jnp.pad(sentence_length.astype(jnp.int32), (0, B_pad - B)).reshape(B_pad, 1)

    if topic_vectors is not None:           # config.topic_init == True path
        h0 = jnp.pad(topic_vectors.astype(f32), ((0, B_pad - B), (0, H_pad - H)))
    else:
        h0 = jnp.zeros((B_pad, H_pad), f32)
    h0s = jnp.stack([h0, h0], axis=0)                                           # (2,Bp,Hp)

    # ---- hoisted input projection: ONE large bf16 MXU matmul for both directions --
    # (b_ih is folded into GX, so only b_hh is needed inside the recurrence.)
    wih_cat = jnp.concatenate([wih_f, wih_b], axis=0).T.astype(bf16)            # (D, 6Hp)
    bih_cat = jnp.concatenate([bih_f, bih_b], axis=0).reshape(1, 2 * G)
    gx = jnp.dot(x.reshape(T_pad * B_pad, D).astype(bf16), wih_cat,
                 preferred_element_type=f32) + bih_cat
    gx = gx.reshape(T_pad, B_pad, 2 * G)
    gxf = gx[:, :, :G]                      # forward-direction gate slab  (T, B, 3Hp)
    gxb = gx[:, :, G:]                      # backward-direction gate slab (T, B, 3Hp)

    # Stacked direction-invariant operands (fewer pallas_call operands / DMAs).
    whh_t = jnp.stack([whh_f.T, whh_b.T], axis=0).astype(bf16)                  # (2,Hp,3Hp)
    bhh = jnp.stack([bhh_f, bhh_b], axis=0)                                     # (2,1,3Hp)

    # Loop-invariant operands: constant index_map; single-buffer when supported.
    def inv_spec(shape):
        imap = lambda i, _n=len(shape): (0,) * _n
        try:
            return pl.BlockSpec(shape, imap, pipeline_mode=pl.Buffered(1))
        except Exception:
            return pl.BlockSpec(shape, imap)

    grid_spec = pltpu.PrefetchScalarGridSpec(
        num_scalar_prefetch=0,
        grid=(nb,),
        in_specs=[
            inv_spec((B_pad, 1)),                                        # lengths
            pl.BlockSpec((Tt, B_pad, G), lambda i: (i, 0, 0)),           # GX forward
            pl.BlockSpec((Tt, B_pad, G), lambda i: (nb - 1 - i, 0, 0)),  # GX backward
            inv_spec((2, H_pad, G)),                                     # W_hh (stacked)
            inv_spec((2, 1, G)),                                         # b_hh (stacked)
            inv_spec((2, B_pad, H_pad)),                                 # h0   (stacked)
        ],
        out_specs=pl.BlockSpec((2, B_pad, H_pad), lambda i: (0, 0, 0)),
        scratch_shapes=[pltpu.VMEM((B_pad, H_pad), jnp.float32),
                        pltpu.VMEM((B_pad, H_pad), jnp.float32)],
    )

    out = pl.pallas_call(
        _bigru_recurrence_kernel,
        out_shape=jax.ShapeDtypeStruct((2, B_pad, H_pad), jnp.float32),
        grid_spec=grid_spec,
        compiler_params=pltpu.CompilerParams(
            dimension_semantics=("arbitrary",)),     # time axis carries the recurrence
    )(lengths, gxf, gxb, whh_t, bhh, h0s)

    # concat([h[-1] (backward), h[-2] (forward)], dim=-1); dropout = identity (eval).
    return jnp.concatenate([out[0, :B, :H], out[1, :B, :H]], axis=-1)


# --------------------------------------------------------------------------------------
# Pure-JAX f32 reference (masked bidirectional GRU, torch gate order r,z,n).
# --------------------------------------------------------------------------------------
def bigru_encoder_ref(sentences_btd, sentence_length, params, topic_vectors=None):
    B, T, D = sentences_btd.shape
    H = params["whh_f"].shape[1]
    x = jnp.transpose(sentences_btd, (1, 0, 2)).astype(jnp.float32)
    lengths = sentence_length.astype(jnp.int32)

    def cell(x_t, h, wih, whh, bih, bhh):
        gx = x_t @ wih.T + bih
        gh = h @ whh.T + bhh
        r = jax.nn.sigmoid(gx[:, :H] + gh[:, :H])
        z = jax.nn.sigmoid(gx[:, H:2 * H] + gh[:, H:2 * H])
        n = jnp.tanh(gx[:, 2 * H:] + r * gh[:, 2 * H:])
        return (1.0 - z) * n + z * h

    if topic_vectors is not None:
        hf = topic_vectors.astype(jnp.float32)
        hb = topic_vectors.astype(jnp.float32)
    else:
        hf = jnp.zeros((B, H), jnp.float32)
        hb = jnp.zeros((B, H), jnp.float32)

    for t in range(T):
        m_f = (t < lengths)[:, None]
        hf = jnp.where(m_f, cell(x[t], hf, params["wih_f"], params["whh_f"],
                                 params["bih_f"], params["bhh_f"]), hf)
        tb = T - 1 - t
        m_b = (tb < lengths)[:, None]
        hb = jnp.where(m_b, cell(x[tb], hb, params["wih_b"], params["whh_b"],
                                 params["bih_b"], params["bhh_b"]), hb)
    return jnp.concatenate([hb, hf], axis=-1)


def init_params(key, input_dim, hidden_dim):
    """PyTorch-style uniform(-1/sqrt(H), 1/sqrt(H)) init, torch weight layout."""
    bound = hidden_dim ** -0.5
    ks = jax.random.split(key, 8)
    u = lambda kk, shape: jax.random.uniform(kk, shape, jnp.float32, -bound, bound)
    return {
        "wih_f": u(ks[0], (3 * hidden_dim, input_dim)),
        "whh_f": u(ks[1], (3 * hidden_dim, hidden_dim)),
        "bih_f": u(ks[2], (3 * hidden_dim,)),
        "bhh_f": u(ks[3], (3 * hidden_dim,)),
        "wih_b": u(ks[4], (3 * hidden_dim, input_dim)),
        "whh_b": u(ks[5], (3 * hidden_dim, hidden_dim)),
        "bih_b": u(ks[6], (3 * hidden_dim,)),
        "bhh_b": u(ks[7], (3 * hidden_dim,)),
    }


if __name__ == "__main__":
    B, T, D, H = 4, 10, 16, 32

    key = jax.random.PRNGKey(0)
    k_x, k_p, k_topic = jax.random.split(key, 3)

    sentences = jax.random.normal(k_x, (B, T, D), jnp.float32)   # (batch, seq, input_dim)
    sentence_length = jnp.array([10, 5, 3, 7], jnp.int32)        # variable lengths
    params = init_params(k_p, D, H)
    topic_vectors = 0.1 * jax.random.normal(k_topic, (B, H), jnp.float32)

    # topic_init = False path (time_block=4 -> 3 time blocks incl. padded tail).
    run = jax.jit(lambda s, l: bigru_encoder_pallas(s, l, params, time_block=4))
    out = jax.block_until_ready(run(sentences, sentence_length))
    ref = bigru_encoder_ref(sentences, sentence_length, params)
    assert out.shape == (B, 2 * H)
    assert jnp.allclose(out, ref, atol=2e-2, rtol=2e-2), "mismatch vs reference (no topic)"

    # topic_init = True path.
    run_t = jax.jit(lambda s, l, tv: bigru_encoder_pallas(s, l, params, tv, time_block=4))
    out_t = jax.block_until_ready(run_t(sentences, sentence_length, topic_vectors))
    ref_t = bigru_encoder_ref(sentences, sentence_length, params, topic_vectors)
    assert jnp.allclose(out_t, ref_t, atol=2e-2, rtol=2e-2), "mismatch vs reference (topic)"

    print("KERNEL_OK")
</pallas_src>

<mosaic_0001>
module attributes {stable_mosaic.version = 11 : i64} {
  func.func @_bigru_recurrence_kernel(%arg0: i32, %arg1: memref<8x1xi32, #tpu.memory_space<vmem>>, %arg2: memref<4x8x384xf32, #tpu.memory_space<vmem>>, %arg3: memref<4x8x384xf32, #tpu.memory_space<vmem>>, %arg4: memref<2x128x384xbf16, #tpu.memory_space<vmem>>, %arg5: memref<2x1x384xf32, #tpu.memory_space<vmem>>, %arg6: memref<2x8x128xf32, #tpu.memory_space<vmem>>, %arg7: memref<2x8x128xf32, #tpu.memory_space<vmem>>, %arg8: memref<8x128xf32, #tpu.memory_space<vmem>>, %arg9: memref<8x128xf32, #tpu.memory_space<vmem>>) attributes {dimension_semantics = [#tpu.dimension_semantics<arbitrary>], iteration_bounds = array<i64: 3>, scalar_prefetch = 0 : i64, scratch_operands = 2 : i64, tpu.core_type = #tpu.core_type<tc>, window_params = [{pipeline_mode = #tpu.pipeline_mode<synchronous>, transform_indices = @transform_0, window_bounds = array<i64: 8, 1>}, {transform_indices = @transform_1, window_bounds = array<i64: 4, 8, 384>}, {transform_indices = @transform_2, window_bounds = array<i64: 4, 8, 384>}, {pipeline_mode = #tpu.pipeline_mode<synchronous>, transform_indices = @transform_3, window_bounds = array<i64: 2, 128, 384>}, {pipeline_mode = #tpu.pipeline_mode<synchronous>, transform_indices = @transform_4, window_bounds = array<i64: 2, 1, 384>}, {pipeline_mode = #tpu.pipeline_mode<synchronous>, transform_indices = @transform_5, window_bounds = array<i64: 2, 8, 128>}, {pipeline_mode = #tpu.pipeline_mode<synchronous>, transform_indices = @transform_6, window_bounds = array<i64: 2, 8, 128>}]} {
    %c0_i32 = arith.constant 0 : i32
    %0 = arith.cmpi eq, %arg0, %c0_i32 : i32
    %1 = arith.extui %0 : i1 to i32
    %c0_i32_0 = arith.constant 0 : i32
    %2 = arith.cmpi ne, %1, %c0_i32_0 : i32
    scf.if %2 {
      %c0_74 = arith.constant 0 : index
      %c0_75 = arith.constant 0 : index
      %c0_76 = arith.constant 0 : index
      %323 = vector.load %arg6[%c0_74, %c0_75, %c0_76] : memref<2x8x128xf32, #tpu.memory_space<vmem>>, vector<1x8x128xf32>
      %324 = vector.shape_cast %323 : vector<1x8x128xf32> to vector<8x128xf32>
      %c0_77 = arith.constant 0 : index
      %c0_78 = arith.constant 0 : index
      %325 = vector.load %arg8[%c0_77, %c0_78] : memref<8x128xf32, #tpu.memory_space<vmem>>, vector<8x128xf32>
      tpu.vector_store %arg8[%c0_77, %c0_78], %324 {strides = array<i32>} : memref<8x128xf32, #tpu.memory_space<vmem>>, vector<8x128xf32>,
      %c1_79 = arith.constant 1 : index
      %c0_80 = arith.constant 0 : index
      %c0_81 = arith.constant 0 : index
      %326 = vector.load %arg6[%c1_79, %c0_80, %c0_81] : memref<2x8x128xf32, #tpu.memory_space<vmem>>, vector<1x8x128xf32>
      %327 = vector.shape_cast %326 : vector<1x8x128xf32> to vector<8x128xf32>
      %c0_82 = arith.constant 0 : index
      %c0_83 = arith.constant 0 : index
      %328 = vector.load %arg9[%c0_82, %c0_83] : memref<8x128xf32, #tpu.memory_space<vmem>>, vector<8x128xf32>
      tpu.vector_store %arg9[%c0_82, %c0_83], %327 {strides = array<i32>} : memref<8x128xf32, #tpu.memory_space<vmem>>, vector<8x128xf32>,
    } else {
    }
    %c0 = arith.constant 0 : index
    %c0_1 = arith.constant 0 : index
    %3 = vector.load %arg1[%c0, %c0_1] : memref<8x1xi32, #tpu.memory_space<vmem>>, vector<8x1xi32>
    %c0_2 = arith.constant 0 : index
    %c0_3 = arith.constant 0 : index
    %c0_4 = arith.constant 0 : index
    %4 = vector.load %arg4[%c0_2, %c0_3, %c0_4] : memref<2x128x384xbf16, #tpu.memory_space<vmem>>, vector<1x128x384xbf16>
    %5 = vector.shape_cast %4 : vector<1x128x384xbf16> to vector<128x384xbf16>
    %c1 = arith.constant 1 : index
    %c0_5 = arith.constant 0 : index
    %c0_6 = arith.constant 0 : index
    %6 = vector.load %arg4[%c1, %c0_5, %c0_6] : memref<2x128x384xbf16, #tpu.memory_space<vmem>>, vector<1x128x384xbf16>
    %7 = vector.shape_cast %6 : vector<1x128x384xbf16> to vector<128x384xbf16>
    %c0_7 = arith.constant 0 : index
    %c0_8 = arith.constant 0 : index
    %c0_9 = arith.constant 0 : index
    %8 = vector.load %arg5[%c0_7, %c0_8, %c0_9] : memref<2x1x384xf32, #tpu.memory_space<vmem>>, vector<1x1x384xf32>
    %9 = vector.shape_cast %8 : vector<1x1x384xf32> to vector<1x384xf32>
    %c1_10 = arith.constant 1 : index
    %c0_11 = arith.constant 0 : index
    %c0_12 = arith.constant 0 : index
    %10 = vector.load %arg5[%c1_10, %c0_11, %c0_12] : memref<2x1x384xf32, #tpu.memory_space<vmem>>, vector<1x1x384xf32>
    %11 = vector.shape_cast %10 : vector<1x1x384xf32> to vector<1x384xf32>
    %c0_13 = arith.constant 0 : index
    %c0_14 = arith.constant 0 : index
    %12 = vector.load %arg8[%c0_13, %c0_14] : memref<8x128xf32, #tpu.memory_space<vmem>>, vector<8x128xf32>
    %c0_15 = arith.constant 0 : index
    %c0_16 = arith.constant 0 : index
    %13 = vector.load %arg9[%c0_15, %c0_16] : memref<8x128xf32, #tpu.memory_space<vmem>>, vector<8x128xf32>
    %c0_i32_17 = arith.constant 0 : i32
    %c4_i32 = arith.constant 4 : i32
    %14 = arith.muli %arg0, %c4_i32 : i32
    %15 = arith.addi %14, %c0_i32_17 : i32
    %c11_i32 = arith.constant 11 : i32
    %16 = arith.subi %c11_i32, %15 : i32
    %17 = arith.index_cast %c0_i32_17 : i32 to index
    %c0_18 = arith.constant 0 : index
    %c0_19 = arith.constant 0 : index
    %18 = vector.load %arg2[%17, %c0_18, %c0_19] : memref<4x8x384xf32, #tpu.memory_space<vmem>>, vector<1x8x384xf32>
    %19 = vector.shape_cast %18 : vector<1x8x384xf32> to vector<8x384xf32>
    %20 = arith.truncf %12 : vector<8x128xf32> to vector<8x128xbf16>
    %cst = arith.constant dense<0.000000e+00> : vector<8x384xf32>
    %21 = tpu.matmul %20, %5, %cst {dimension_numbers = #tpu.dot_dimension_numbers<[1], [0], [0], [1], [0, 0, 1, 1], [], []>} : vector<8x128xbf16>, vector<128x384xbf16>, vector<8x384xf32> -> vector<8x384xf32>
    %22 = vector.broadcast %9 : vector<1x384xf32> to vector<8x384xf32>
    %23 = arith.addf %21, %22 : vector<8x384xf32>
    %24 = vector.extract_strided_slice %19 {offsets = [0, 0], sizes = [8, 128], strides = [1, 1]} : vector<8x384xf32> to vector<8x128xf32>
    %25 = vector.extract_strided_slice %23 {offsets = [0, 0], sizes = [8, 128], strides = [1, 1]} : vector<8x384xf32> to vector<8x128xf32>
    %26 = arith.addf %24, %25 : vector<8x128xf32>
    %27 = arith.negf %26 : vector<8x128xf32>
    %28 = math.exp %27 : vector<8x128xf32>
    %cst_20 = arith.constant 1.000000e+00 : f32
    %29 = vector.broadcast %cst_20 : f32 to vector<8x128xf32>
    %30 = arith.addf %29, %28 : vector<8x128xf32>
    %31 = arith.divf %29, %30 : vector<8x128xf32>
    %32 = vector.extract_strided_slice %19 {offsets = [0, 128], sizes = [8, 128], strides = [1, 1]} : vector<8x384xf32> to vector<8x128xf32>
    %33 = vector.extract_strided_slice %23 {offsets = [0, 128], sizes = [8, 128], strides = [1, 1]} : vector<8x384xf32> to vector<8x128xf32>
    %34 = arith.addf %32, %33 : vector<8x128xf32>
    %35 = arith.negf %34 : vector<8x128xf32>
    %36 = math.exp %35 : vector<8x128xf32>
    %cst_21 = arith.constant 1.000000e+00 : f32
    %37 = vector.broadcast %cst_21 : f32 to vector<8x128xf32>
    %38 = arith.addf %37, %36 : vector<8x128xf32>
    %39 = arith.divf %37, %38 : vector<8x128xf32>
    %40 = vector.extract_strided_slice %19 {offsets = [0, 256], sizes = [8, 128], strides = [1, 1]} : vector<8x384xf32> to vector<8x128xf32>
    %41 = vector.extract_strided_slice %23 {offsets = [0, 256], sizes = [8, 128], strides = [1, 1]} : vector<8x384xf32> to vector<8x128xf32>
    %42 = arith.mulf %31, %41 : vector<8x128xf32>
    %43 = arith.addf %40, %42 : vector<8x128xf32>
    %44 = math.tanh %43 : vector<8x128xf32>
    %45 = arith.subf %12, %44 : vector<8x128xf32>
    %46 = arith.mulf %39, %45 : vector<8x128xf32>
    %47 = arith.addf %44, %46 : vector<8x128xf32>
    %c3_i32 = arith.constant 3 : i32
    %48 = arith.subi %c3_i32, %c0_i32_17 : i32
    %49 = arith.index_cast %48 : i32 to index
    %c0_22 = arith.constant 0 : index
    %c0_23 = arith.constant 0 : index
    %50 = vector.load %arg3[%49, %c0_22, %c0_23] : memref<4x8x384xf32, #tpu.memory_space<vmem>>, vector<1x8x384xf32>
    %51 = vector.shape_cast %50 : vector<1x8x384xf32> to vector<8x384xf32>
    %52 = arith.truncf %13 : vector<8x128xf32> to vector<8x128xbf16>
    %cst_24 = arith.constant dense<0.000000e+00> : vector<8x384xf32>
    %53 = tpu.matmul %52, %7, %cst_24 {dimension_numbers = #tpu.dot_dimension_numbers<[1], [0], [0], [1], [0, 0, 1, 1], [], []>} : vector<8x128xbf16>, vector<128x384xbf16>, vector<8x384xf32> -> vector<8x384xf32>
    %54 = vector.broadcast %11 : vector<1x384xf32> to vector<8x384xf32>
    %55 = arith.addf %53, %54 : vector<8x384xf32>
    %56 = vector.extract_strided_slice %51 {offsets = [0, 0], sizes = [8, 128], strides = [1, 1]} : vector<8x384xf32> to vector<8x128xf32>
    %57 = vector.extract_strided_slice %55 {offsets = [0, 0], sizes = [8, 128], strides = [1, 1]} : vector<8x384xf32> to vector<8x128xf32>
    %58 = arith.addf %56, %57 : vector<8x128xf32>
    %59 = arith.negf %58 : vector<8x128xf32>
    %60 = math.exp %59 : vector<8x128xf32>
    %cst_25 = arith.constant 1.000000e+00 : f32
    %61 = vector.broadcast %cst_25 : f32 to vector<8x128xf32>
    %62 = arith.addf %61, %60 : vector<8x128xf32>
    %63 = arith.divf %61, %62 : vector<8x128xf32>
    %64 = vector.extract_strided_slice %51 {offsets = [0, 128], sizes = [8, 128], strides = [1, 1]} : vector<8x384xf32> to vector<8x128xf32>
    %65 = vector.extract_strided_slice %55 {offsets = [0, 128], sizes = [8, 128], strides = [1, 1]} : vector<8x384xf32> to vector<8x128xf32>
    %66 = arith.addf %64, %65 : vector<8x128xf32>
    %67 = arith.negf %66 : vector<8x128xf32>
    %68 = math.exp %67 : vector<8x128xf32>
    %cst_26 = arith.constant 1.000000e+00 : f32
    %69 = vector.broadcast %cst_26 : f32 to vector<8x128xf32>
    %70 = arith.addf %69, %68 : vector<8x128xf32>
    %71 = arith.divf %69, %70 : vector<8x128xf32>
    %72 = vector.extract_strided_slice %51 {offsets = [0, 256], sizes = [8, 128], strides = [1, 1]} : vector<8x384xf32> to vector<8x128xf32>
    %73 = vector.extract_strided_slice %55 {offsets = [0, 256], sizes = [8, 128], strides = [1, 1]} : vector<8x384xf32> to vector<8x128xf32>
    %74 = arith.mulf %63, %73 : vector<8x128xf32>
    %75 = arith.addf %72, %74 : vector<8x128xf32>
    %76 = math.tanh %75 : vector<8x128xf32>
    %77 = arith.subf %13, %76 : vector<8x128xf32>
    %78 = arith.mulf %71, %77 : vector<8x128xf32>
    %79 = arith.addf %76, %78 : vector<8x128xf32>
    %80 = vector.broadcast %15 : i32 to vector<8x1xi32>
    %81 = arith.cmpi slt, %80, %3 : vector<8x1xi32>
    %82 = vector.shape_cast %81 : vector<8x1xi1> to vector<8x1xi1>
    %83 = vector.broadcast %82 : vector<8x1xi1> to vector<8x128xi1>
    %84 = arith.select %83, %47, %12 : vector<8x128xi1>, vector<8x128xf32>
    %85 = vector.broadcast %16 : i32 to vector<8x1xi32>
    %86 = arith.cmpi slt, %85, %3 : vector<8x1xi32>
    %87 = vector.shape_cast %86 : vector<8x1xi1> to vector<8x1xi1>
    %88 = vector.broadcast %87 : vector<8x1xi1> to vector<8x128xi1>
    %89 = arith.select %88, %79, %13 : vector<8x128xi1>, vector<8x128xf32>
    %c1_i32 = arith.constant 1 : i32
    %c4_i32_27 = arith.constant 4 : i32
    %90 = arith.muli %arg0, %c4_i32_27 : i32
    %91 = arith.addi %90, %c1_i32 : i32
    %c11_i32_28 = arith.constant 11 : i32
    %92 = arith.subi %c11_i32_28, %91 : i32
    %93 = arith.index_cast %c1_i32 : i32 to index
    %c0_29 = arith.constant 0 : index
    %c0_30 = arith.constant 0 : index
    %94 = vector.load %arg2[%93, %c0_29, %c0_30] : memref<4x8x384xf32, #tpu.memory_space<vmem>>, vector<1x8x384xf32>
    %95 = vector.shape_cast %94 : vector<1x8x384xf32> to vector<8x384xf32>
    %96 = arith.truncf %84 : vector<8x128xf32> to vector<8x128xbf16>
    %cst_31 = arith.constant dense<0.000000e+00> : vector<8x384xf32>
    %97 = tpu.matmul %96, %5, %cst_31 {dimension_numbers = #tpu.dot_dimension_numbers<[1], [0], [0], [1], [0, 0, 1, 1], [], []>} : vector<8x128xbf16>, vector<128x384xbf16>, vector<8x384xf32> -> vector<8x384xf32>
    %98 = vector.broadcast %9 : vector<1x384xf32> to vector<8x384xf32>
    %99 = arith.addf %97, %98 : vector<8x384xf32>
    %100 = vector.extract_strided_slice %95 {offsets = [0, 0], sizes = [8, 128], strides = [1, 1]} : vector<8x384xf32> to vector<8x128xf32>
    %101 = vector.extract_strided_slice %99 {offsets = [0, 0], sizes = [8, 128], strides = [1, 1]} : vector<8x384xf32> to vector<8x128xf32>
    %102 = arith.addf %100, %101 : vector<8x128xf32>
    %103 = arith.negf %102 : vector<8x128xf32>
    %104 = math.exp %103 : vector<8x128xf32>
    %cst_32 = arith.constant 1.000000e+00 : f32
    %105 = vector.broadcast %cst_32 : f32 to vector<8x128xf32>
    %106 = arith.addf %105, %104 : vector<8x128xf32>
    %107 = arith.divf %105, %106 : vector<8x128xf32>
    %108 = vector.extract_strided_slice %95 {offsets = [0, 128], sizes = [8, 128], strides = [1, 1]} : vector<8x384xf32> to vector<8x128xf32>
    %109 = vector.extract_strided_slice %99 {offsets = [0, 128], sizes = [8, 128], strides = [1, 1]} : vector<8x384xf32> to vector<8x128xf32>
    %110 = arith.addf %108, %109 : vector<8x128xf32>
    %111 = arith.negf %110 : vector<8x128xf32>
    %112 = math.exp %111 : vector<8x128xf32>
    %cst_33 = arith.constant 1.000000e+00 : f32
    %113 = vector.broadcast %cst_33 : f32 to vector<8x128xf32>
    %114 = arith.addf %113, %112 : vector<8x128xf32>
    %115 = arith.divf %113, %114 : vector<8x128xf32>
    %116 = vector.extract_strided_slice %95 {offsets = [0, 256], sizes = [8, 128], strides = [1, 1]} : vector<8x384xf32> to vector<8x128xf32>
    %117 = vector.extract_strided_slice %99 {offsets = [0, 256], sizes = [8, 128], strides = [1, 1]} : vector<8x384xf32> to vector<8x128xf32>
    %118 = arith.mulf %107, %117 : vector<8x128xf32>
    %119 = arith.addf %116, %118 : vector<8x128xf32>
    %120 = math.tanh %119 : vector<8x128xf32>
    %121 = arith.subf %84, %120 : vector<8x128xf32>
    %122 = arith.mulf %115, %121 : vector<8x128xf32>
    %123 = arith.addf %120, %122 : vector<8x128xf32>
    %c3_i32_34 = arith.constant 3 : i32
    %124 = arith.subi %c3_i32_34, %c1_i32 : i32
    %125 = arith.index_cast %124 : i32 to index
    %c0_35 = arith.constant 0 : index
    %c0_36 = arith.constant 0 : index
    %126 = vector.load %arg3[%125, %c0_35, %c0_36] : memref<4x8x384xf32, #tpu.memory_space<vmem>>, vector<1x8x384xf32>
    %127 = vector.shape_cast %126 : vector<1x8x384xf32> to vector<8x384xf32>
    %128 = arith.truncf %89 : vector<8x128xf32> to vector<8x128xbf16>
    %cst_37 = arith.constant dense<0.000000e+00> : vector<8x384xf32>
    %129 = tpu.matmul %128, %7, %cst_37 {dimension_numbers = #tpu.dot_dimension_numbers<[1], [0], [0], [1], [0, 0, 1, 1], [], []>} : vector<8x128xbf16>, vector<128x384xbf16>, vector<8x384xf32> -> vector<8x384xf32>
    %130 = vector.broadcast %11 : vector<1x384xf32> to vector<8x384xf32>
    %131 = arith.addf %129, %130 : vector<8x384xf32>
    %132 = vector.extract_strided_slice %127 {offsets = [0, 0], sizes = [8, 128], strides = [1, 1]} : vector<8x384xf32> to vector<8x128xf32>
    %133 = vector.extract_strided_slice %131 {offsets = [0, 0], sizes = [8, 128], strides = [1, 1]} : vector<8x384xf32> to vector<8x128xf32>
    %134 = arith.addf %132, %133 : vector<8x128xf32>
    %135 = arith.negf %134 : vector<8x128xf32>
    %136 = math.exp %135 : vector<8x128xf32>
    %cst_38 = arith.constant 1.000000e+00 : f32
    %137 = vector.broadcast %cst_38 : f32 to vector<8x128xf32>
    %138 = arith.addf %137, %136 : vector<8x128xf32>
    %139 = arith.divf %137, %138 : vector<8x128xf32>
    %140 = vector.extract_strided_slice %127 {offsets = [0, 128], sizes = [8, 128], strides = [1, 1]} : vector<8x384xf32> to vector<8x128xf32>
    %141 = vector.extract_strided_slice %131 {offsets = [0, 128], sizes = [8, 128], strides = [1, 1]} : vector<8x384xf32> to vector<8x128xf32>
    %142 = arith.addf %140, %141 : vector<8x128xf32>
    %143 = arith.negf %142 : vector<8x128xf32>
    %144 = math.exp %143 : vector<8x128xf32>
    %cst_39 = arith.constant 1.000000e+00 : f32
    %145 = vector.broadcast %cst_39 : f32 to vector<8x128xf32>
    %146 = arith.addf %145, %144 : vector<8x128xf32>
    %147 = arith.divf %145, %146 : vector<8x128xf32>
    %148 = vector.extract_strided_slice %127 {offsets = [0, 256], sizes = [8, 128], strides = [1, 1]} : vector<8x384xf32> to vector<8x128xf32>
    %149 = vector.extract_strided_slice %131 {offsets = [0, 256], sizes = [8, 128], strides = [1, 1]} : vector<8x384xf32> to vector<8x128xf32>
    %150 = arith.mulf %139, %149 : vector<8x128xf32>
    %151 = arith.addf %148, %150 : vector<8x128xf32>
    %152 = math.tanh %151 : vector<8x128xf32>
    %153 = arith.subf %89, %152 : vector<8x128xf32>
    %154 = arith.mulf %147, %153 : vector<8x128xf32>
    %155 = arith.addf %152, %154 : vector<8x128xf32>
    %156 = vector.broadcast %91 : i32 to vector<8x1xi32>
    %157 = arith.cmpi slt, %156, %3 : vector<8x1xi32>
    %158 = vector.shape_cast %157 : vector<8x1xi1> to vector<8x1xi1>
    %159 = vector.broadcast %158 : vector<8x1xi1> to vector<8x128xi1>
    %160 = arith.select %159, %123, %84 : vector<8x128xi1>, vector<8x128xf32>
    %161 = vector.broadcast %92 : i32 to vector<8x1xi32>
    %162 = arith.cmpi slt, %161, %3 : vector<8x1xi32>
    %163 = vector.shape_cast %162 : vector<8x1xi1> to vector<8x1xi1>
    %164 = vector.broadcast %163 : vector<8x1xi1> to vector<8x128xi1>
    %165 = arith.select %164, %155, %89 : vector<8x128xi1>, vector<8x128xf32>
    %c2_i32 = arith.constant 2 : i32
    %c4_i32_40 = arith.constant 4 : i32
    %166 = arith.muli %arg0, %c4_i32_40 : i32
    %167 = arith.addi %166, %c2_i32 : i32
    %c11_i32_41 = arith.constant 11 : i32
    %168 = arith.subi %c11_i32_41, %167 : i32
    %169 = arith.index_cast %c2_i32 : i32 to index
    %c0_42 = arith.constant 0 : index
    %c0_43 = arith.constant 0 : index
    %170 = vector.load %arg2[%169, %c0_42, %c0_43] : memref<4x8x384xf32, #tpu.memory_space<vmem>>, vector<1x8x384xf32>
    %171 = vector.shape_cast %170 : vector<1x8x384xf32> to vector<8x384xf32>
    %172 = arith.truncf %160 : vector<8x128xf32> to vector<8x128xbf16>
    %cst_44 = arith.constant dense<0.000000e+00> : vector<8x384xf32>
    %173 = tpu.matmul %172, %5, %cst_44 {dimension_numbers = #tpu.dot_dimension_numbers<[1], [0], [0], [1], [0, 0, 1, 1], [], []>} : vector<8x128xbf16>, vector<128x384xbf16>, vector<8x384xf32> -> vector<8x384xf32>
    %174 = vector.broadcast %9 : vector<1x384xf32> to vector<8x384xf32>
    %175 = arith.addf %173, %174 : vector<8x384xf32>
    %176 = vector.extract_strided_slice %171 {offsets = [0, 0], sizes = [8, 128], strides = [1, 1]} : vector<8x384xf32> to vector<8x128xf32>
    %177 = vector.extract_strided_slice %175 {offsets = [0, 0], sizes = [8, 128], strides = [1, 1]} : vector<8x384xf32> to vector<8x128xf32>
    %178 = arith.addf %176, %177 : vector<8x128xf32>
    %179 = arith.negf %178 : vector<8x128xf32>
    %180 = math.exp %179 : vector<8x128xf32>
    %cst_45 = arith.constant 1.000000e+00 : f32
    %181 = vector.broadcast %cst_45 : f32 to vector<8x128xf32>
    %182 = arith.addf %181, %180 : vector<8x128xf32>
    %183 = arith.divf %181, %182 : vector<8x128xf32>
    %184 = vector.extract_strided_slice %171 {offsets = [0, 128], sizes = [8, 128], strides = [1, 1]} : vector<8x384xf32> to vector<8x128xf32>
    %185 = vector.extract_strided_slice %175 {offsets = [0, 128], sizes = [8, 128], strides = [1, 1]} : vector<8x384xf32> to vector<8x128xf32>
    %186 = arith.addf %184, %185 : vector<8x128xf32>
    %187 = arith.negf %186 : vector<8x128xf32>
    %188 = math.exp %187 : vector<8x128xf32>
    %cst_46 = arith.constant 1.000000e+00 : f32
    %189 = vector.broadcast %cst_46 : f32 to vector<8x128xf32>
    %190 = arith.addf %189, %188 : vector<8x128xf32>
    %191 = arith.divf %189, %190 : vector<8x128xf32>
    %192 = vector.extract_strided_slice %171 {offsets = [0, 256], sizes = [8, 128], strides = [1, 1]} : vector<8x384xf32> to vector<8x128xf32>
    %193 = vector.extract_strided_slice %175 {offsets = [0, 256], sizes = [8, 128], strides = [1, 1]} : vector<8x384xf32> to vector<8x128xf32>
    %194 = arith.mulf %183, %193 : vector<8x128xf32>
    %195 = arith.addf %192, %194 : vector<8x128xf32>
    %196 = math.tanh %195 : vector<8x128xf32>
    %197 = arith.subf %160, %196 : vector<8x128xf32>
    %198 = arith.mulf %191, %197 : vector<8x128xf32>
    %199 = arith.addf %196, %198 : vector<8x128xf32>
    %c3_i32_47 = arith.constant 3 : i32
    %200 = arith.subi %c3_i32_47, %c2_i32 : i32
    %201 = arith.index_cast %200 : i32 to index
    %c0_48 = arith.constant 0 : index
    %c0_49 = arith.constant 0 : index
    %202 = vector.load %arg3[%201, %c0_48, %c0_49] : memref<4x8x384xf32, #tpu.memory_space<vmem>>, vector<1x8x384xf32>
    %203 = vector.shape_cast %202 : vector<1x8x384xf32> to vector<8x384xf32>
    %204 = arith.truncf %165 : vector<8x128xf32> to vector<8x128xbf16>
    %cst_50 = arith.constant dense<0.000000e+00> : vector<8x384xf32>
    %205 = tpu.matmul %204, %7, %cst_50 {dimension_numbers = #tpu.dot_dimension_numbers<[1], [0], [0], [1], [0, 0, 1, 1], [], []>} : vector<8x128xbf16>, vector<128x384xbf16>, vector<8x384xf32> -> vector<8x384xf32>
    %206 = vector.broadcast %11 : vector<1x384xf32> to vector<8x384xf32>
    %207 = arith.addf %205, %206 : vector<8x384xf32>
    %208 = vector.extract_strided_slice %203 {offsets = [0, 0], sizes = [8, 128], strides = [1, 1]} : vector<8x384xf32> to vector<8x128xf32>
    %209 = vector.extract_strided_slice %207 {offsets = [0, 0], sizes = [8, 128], strides = [1, 1]} : vector<8x384xf32> to vector<8x128xf32>
    %210 = arith.addf %208, %209 : vector<8x128xf32>
    %211 = arith.negf %210 : vector<8x128xf32>
    %212 = math.exp %211 : vector<8x128xf32>
    %cst_51 = arith.constant 1.000000e+00 : f32
    %213 = vector.broadcast %cst_51 : f32 to vector<8x128xf32>
    %214 = arith.addf %213, %212 : vector<8x128xf32>
    %215 = arith.divf %213, %214 : vector<8x128xf32>
    %216 = vector.extract_strided_slice %203 {offsets = [0, 128], sizes = [8, 128], strides = [1, 1]} : vector<8x384xf32> to vector<8x128xf32>
    %217 = vector.extract_strided_slice %207 {offsets = [0, 128], sizes = [8, 128], strides = [1, 1]} : vector<8x384xf32> to vector<8x128xf32>
    %218 = arith.addf %216, %217 : vector<8x128xf32>
    %219 = arith.negf %218 : vector<8x128xf32>
    %220 = math.exp %219 : vector<8x128xf32>
    %cst_52 = arith.constant 1.000000e+00 : f32
    %221 = vector.broadcast %cst_52 : f32 to vector<8x128xf32>
    %222 = arith.addf %221, %220 : vector<8x128xf32>
    %223 = arith.divf %221, %222 : vector<8x128xf32>
    %224 = vector.extract_strided_slice %203 {offsets = [0, 256], sizes = [8, 128], strides = [1, 1]} : vector<8x384xf32> to vector<8x128xf32>
    %225 = vector.extract_strided_slice %207 {offsets = [0, 256], sizes = [8, 128], strides = [1, 1]} : vector<8x384xf32> to vector<8x128xf32>
    %226 = arith.mulf %215, %225 : vector<8x128xf32>
    %227 = arith.addf %224, %226 : vector<8x128xf32>
    %228 = math.tanh %227 : vector<8x128xf32>
    %229 = arith.subf %165, %228 : vector<8x128xf32>
    %230 = arith.mulf %223, %229 : vector<8x128xf32>
    %231 = arith.addf %228, %230 : vector<8x128xf32>
    %232 = vector.broadcast %167 : i32 to vector<8x1xi32>
    %233 = arith.cmpi slt, %232, %3 : vector<8x1xi32>
    %234 = vector.shape_cast %233 : vector<8x1xi1> to vector<8x1xi1>
    %235 = vector.broadcast %234 : vector<8x1xi1> to vector<8x128xi1>
    %236 = arith.select %235, %199, %160 : vector<8x128xi1>, vector<8x128xf32>
    %237 = vector.broadcast %168 : i32 to vector<8x1xi32>
    %238 = arith.cmpi slt, %237, %3 : vector<8x1xi32>
    %239 = vector.shape_cast %238 : vector<8x1xi1> to vector<8x1xi1>
    %240 = vector.broadcast %239 : vector<8x1xi1> to vector<8x128xi1>
    %241 = arith.select %240, %231, %165 : vector<8x128xi1>, vector<8x128xf32>
    %c3_i32_53 = arith.constant 3 : i32
    %c4_i32_54 = arith.constant 4 : i32
    %242 = arith.muli %arg0, %c4_i32_54 : i32
    %243 = arith.addi %242, %c3_i32_53 : i32
    %c11_i32_55 = arith.constant 11 : i32
    %244 = arith.subi %c11_i32_55, %243 : i32
    %245 = arith.index_cast %c3_i32_53 : i32 to index
    %c0_56 = arith.constant 0 : index
    %c0_57 = arith.constant 0 : index
    %246 = vector.load %arg2[%245, %c0_56, %c0_57] : memref<4x8x384xf32, #tpu.memory_space<vmem>>, vector<1x8x384xf32>
    %247 = vector.shape_cast %246 : vector<1x8x384xf32> to vector<8x384xf32>
    %248 = arith.truncf %236 : vector<8x128xf32> to vector<8x128xbf16>
    %cst_58 = arith.constant dense<0.000000e+00> : vector<8x384xf32>
    %249 = tpu.matmul %248, %5, %cst_58 {dimension_numbers = #tpu.dot_dimension_numbers<[1], [0], [0], [1], [0, 0, 1, 1], [], []>} : vector<8x128xbf16>, vector<128x384xbf16>, vector<8x384xf32> -> vector<8x384xf32>
    %250 = vector.broadcast %9 : vector<1x384xf32> to vector<8x384xf32>
    %251 = arith.addf %249, %250 : vector<8x384xf32>
    %252 = vector.extract_strided_slice %247 {offsets = [0, 0], sizes = [8, 128], strides = [1, 1]} : vector<8x384xf32> to vector<8x128xf32>
    %253 = vector.extract_strided_slice %251 {offsets = [0, 0], sizes = [8, 128], strides = [1, 1]} : vector<8x384xf32> to vector<8x128xf32>
    %254 = arith.addf %252, %253 : vector<8x128xf32>
    %255 = arith.negf %254 : vector<8x128xf32>
    %256 = math.exp %255 : vector<8x128xf32>
    %cst_59 = arith.constant 1.000000e+00 : f32
    %257 = vector.broadcast %cst_59 : f32 to vector<8x128xf32>
    %258 = arith.addf %257, %256 : vector<8x128xf32>
    %259 = arith.divf %257, %258 : vector<8x128xf32>
    %260 = vector.extract_strided_slice %247 {offsets = [0, 128], sizes = [8, 128], strides = [1, 1]} : vector<8x384xf32> to vector<8x128xf32>
    %261 = vector.extract_strided_slice %251 {offsets = [0, 128], sizes = [8, 128], strides = [1, 1]} : vector<8x384xf32> to vector<8x128xf32>
    %262 = arith.addf %260, %261 : vector<8x128xf32>
    %263 = arith.negf %262 : vector<8x128xf32>
    %264 = math.exp %263 : vector<8x128xf32>
    %cst_60 = arith.constant 1.000000e+00 : f32
    %265 = vector.broadcast %cst_60 : f32 to vector<8x128xf32>
    %266 = arith.addf %265, %264 : vector<8x128xf32>
    %267 = arith.divf %265, %266 : vector<8x128xf32>
    %268 = vector.extract_strided_slice %247 {offsets = [0, 256], sizes = [8, 128], strides = [1, 1]} : vector<8x384xf32> to vector<8x128xf32>
    %269 = vector.extract_strided_slice %251 {offsets = [0, 256], sizes = [8, 128], strides = [1, 1]} : vector<8x384xf32> to vector<8x128xf32>
    %270 = arith.mulf %259, %269 : vector<8x128xf32>
    %271 = arith.addf %268, %270 : vector<8x128xf32>
    %272 = math.tanh %271 : vector<8x128xf32>
    %273 = arith.subf %236, %272 : vector<8x128xf32>
    %274 = arith.mulf %267, %273 : vector<8x128xf32>
    %275 = arith.addf %272, %274 : vector<8x128xf32>
    %c3_i32_61 = arith.constant 3 : i32
    %276 = arith.subi %c3_i32_61, %c3_i32_53 : i32
    %277 = arith.index_cast %276 : i32 to index
    %c0_62 = arith.constant 0 : index
    %c0_63 = arith.constant 0 : index
    %278 = vector.load %arg3[%277, %c0_62, %c0_63] : memref<4x8x384xf32, #tpu.memory_space<vmem>>, vector<1x8x384xf32>
    %279 = vector.shape_cast %278 : vector<1x8x384xf32> to vector<8x384xf32>
    %280 = arith.truncf %241 : vector<8x128xf32> to vector<8x128xbf16>
    %cst_64 = arith.constant dense<0.000000e+00> : vector<8x384xf32>
    %281 = tpu.matmul %280, %7, %cst_64 {dimension_numbers = #tpu.dot_dimension_numbers<[1], [0], [0], [1], [0, 0, 1, 1], [], []>} : vector<8x128xbf16>, vector<128x384xbf16>, vector<8x384xf32> -> vector<8x384xf32>
    %282 = vector.broadcast %11 : vector<1x384xf32> to vector<8x384xf32>
    %283 = arith.addf %281, %282 : vector<8x384xf32>
    %284 = vector.extract_strided_slice %279 {offsets = [0, 0], sizes = [8, 128], strides = [1, 1]} : vector<8x384xf32> to vector<8x128xf32>
    %285 = vector.extract_strided_slice %283 {offsets = [0, 0], sizes = [8, 128], strides = [1, 1]} : vector<8x384xf32> to vector<8x128xf32>
    %286 = arith.addf %284, %285 : vector<8x128xf32>
    %287 = arith.negf %286 : vector<8x128xf32>
    %288 = math.exp %287 : vector<8x128xf32>
    %cst_65 = arith.constant 1.000000e+00 : f32
    %289 = vector.broadcast %cst_65 : f32 to vector<8x128xf32>
    %290 = arith.addf %289, %288 : vector<8x128xf32>
    %291 = arith.divf %289, %290 : vector<8x128xf32>
    %292 = vector.extract_strided_slice %279 {offsets = [0, 128], sizes = [8, 128], strides = [1, 1]} : vector<8x384xf32> to vector<8x128xf32>
    %293 = vector.extract_strided_slice %283 {offsets = [0, 128], sizes = [8, 128], strides = [1, 1]} : vector<8x384xf32> to vector<8x128xf32>
    %294 = arith.addf %292, %293 : vector<8x128xf32>
    %295 = arith.negf %294 : vector<8x128xf32>
    %296 = math.exp %295 : vector<8x128xf32>
    %cst_66 = arith.constant 1.000000e+00 : f32
    %297 = vector.broadcast %cst_66 : f32 to vector<8x128xf32>
    %298 = arith.addf %297, %296 : vector<8x128xf32>
    %299 = arith.divf %297, %298 : vector<8x128xf32>
    %300 = vector.extract_strided_slice %279 {offsets = [0, 256], sizes = [8, 128], strides = [1, 1]} : vector<8x384xf32> to vector<8x128xf32>
    %301 = vector.extract_strided_slice %283 {offsets = [0, 256], sizes = [8, 128], strides = [1, 1]} : vector<8x384xf32> to vector<8x128xf32>
    %302 = arith.mulf %291, %301 : vector<8x128xf32>
    %303 = arith.addf %300, %302 : vector<8x128xf32>
    %304 = math.tanh %303 : vector<8x128xf32>
    %305 = arith.subf %241, %304 : vector<8x128xf32>
    %306 = arith.mulf %299, %305 : vector<8x128xf32>
    %307 = arith.addf %304, %306 : vector<8x128xf32>
    %308 = vector.broadcast %243 : i32 to vector<8x1xi32>
    %309 = arith.cmpi slt, %308, %3 : vector<8x1xi32>
    %310 = vector.shape_cast %309 : vector<8x1xi1> to vector<8x1xi1>
    %311 = vector.broadcast %310 : vector<8x1xi1> to vector<8x128xi1>
    %312 = arith.select %311, %275, %236 : vector<8x128xi1>, vector<8x128xf32>
    %313 = vector.broadcast %244 : i32 to vector<8x1xi32>
    %314 = arith.cmpi slt, %313, %3 : vector<8x1xi32>
    %315 = vector.shape_cast %314 : vector<8x1xi1> to vector<8x1xi1>
    %316 = vector.broadcast %315 : vector<8x1xi1> to vector<8x128xi1>
    %317 = arith.select %316, %307, %241 : vector<8x128xi1>, vector<8x128xf32>
    %c4_i32_67 = arith.constant 4 : i32
    %c0_68 = arith.constant 0 : index
    %c0_69 = arith.constant 0 : index
    %318 = vector.load %arg8[%c0_68, %c0_69] : memref<8x128xf32, #tpu.memory_space<vmem>>, vector<8x128xf32>
    tpu.vector_store %arg8[%c0_68, %c0_69], %312 {strides = array<i32>} : memref<8x128xf32, #tpu.memory_space<vmem>>, vector<8x128xf32>,
    %c0_70 = arith.constant 0 : index
    %c0_71 = arith.constant 0 : index
    %319 = vector.load %arg9[%c0_70, %c0_71] : memref<8x128xf32, #tpu.memory_space<vmem>>, vector<8x128xf32>
    tpu.vector_store %arg9[%c0_70, %c0_71], %317 {strides = array<i32>} : memref<8x128xf32, #tpu.memory_space<vmem>>, vector<8x128xf32>,
    %c2_i32_72 = arith.constant 2 : i32
    %320 = arith.cmpi eq, %arg0, %c2_i32_72 : i32
    %321 = arith.extui %320 : i1 to i32
    %c0_i32_73 = arith.constant 0 : i32
    %322 = arith.cmpi ne, %321, %c0_i32_73 : i32
    scf.if %322 {
      %c0_74 = arith.constant 0 : index
      %c0_75 = arith.constant 0 : index
      %c0_76 = arith.constant 0 : index
      %323 = vector.load %arg7[%c0_74, %c0_75, %c0_76] : memref<2x8x128xf32, #tpu.memory_space<vmem>>, vector<1x8x128xf32>
      %324 = vector.shape_cast %323 : vector<1x8x128xf32> to vector<8x128xf32>
      %325 = vector.shape_cast %317 : vector<8x128xf32> to vector<1x8x128xf32>
      tpu.vector_store %arg7[%c0_74, %c0_75, %c0_76], %325 {strides = array<i32>} : memref<2x8x128xf32, #tpu.memory_space<vmem>>, vector<1x8x128xf32>,
      %c1_77 = arith.constant 1 : index
      %c0_78 = arith.constant 0 : index
      %c0_79 = arith.constant 0 : index
      %326 = vector.load %arg7[%c1_77, %c0_78, %c0_79] : memref<2x8x128xf32, #tpu.memory_space<vmem>>, vector<1x8x128xf32>
      %327 = vector.shape_cast %326 : vector<1x8x128xf32> to vector<8x128xf32>
      %328 = vector.shape_cast %312 : vector<8x128xf32> to vector<1x8x128xf32>
      tpu.vector_store %arg7[%c1_77, %c0_78, %c0_79], %328 {strides = array<i32>} : memref<2x8x128xf32, #tpu.memory_space<vmem>>, vector<1x8x128xf32>,
    } else {
    }
    return
  }
  func.func @transform_0(%arg0: i32) -> (i32, i32) {
    %c0_i32 = arith.constant 0 : i32
    %c0_i32_0 = arith.constant 0 : i32
    %c0_i32_1 = arith.constant 0 : i32
    return %c0_i32, %c0_i32_0 : i32, i32
  }
  func.func @transform_1(%arg0: i32) -> (i32, i32, i32) {
    %c0_i32 = arith.constant 0 : i32
    %c0_i32_0 = arith.constant 0 : i32
    %c0_i32_1 = arith.constant 0 : i32
    return %arg0, %c0_i32, %c0_i32_0 : i32, i32, i32
  }
  func.func @transform_2(%arg0: i32) -> (i32, i32, i32) {
    %c2_i32 = arith.constant 2 : i32
    %0 = arith.subi %c2_i32, %arg0 : i32
    %c0_i32 = arith.constant 0 : i32
    %c0_i32_0 = arith.constant 0 : i32
    %c0_i32_1 = arith.constant 0 : i32
    return %0, %c0_i32, %c0_i32_0 : i32, i32, i32
  }
  func.func @transform_3(%arg0: i32) -> (i32, i32, i32) {
    %c0_i32 = arith.constant 0 : i32
    %c0_i32_0 = arith.constant 0 : i32
    %c0_i32_1 = arith.constant 0 : i32
    %c0_i32_2 = arith.constant 0 : i32
    return %c0_i32, %c0_i32_0, %c0_i32_1 : i32, i32, i32
  }
  func.func @transform_4(%arg0: i32) -> (i32, i32, i32) {
    %c0_i32 = arith.constant 0 : i32
    %c0_i32_0 = arith.constant 0 : i32
    %c0_i32_1 = arith.constant 0 : i32
    %c0_i32_2 = arith.constant 0 : i32
    return %c0_i32, %c0_i32_0, %c0_i32_1 : i32, i32, i32
  }
  func.func @transform_5(%arg0: i32) -> (i32, i32, i32) {
    %c0_i32 = arith.constant 0 : i32
    %c0_i32_0 = arith.constant 0 : i32
    %c0_i32_1 = arith.constant 0 : i32
    %c0_i32_2 = arith.constant 0 : i32
    return %c0_i32, %c0_i32_0, %c0_i32_1 : i32, i32, i32
  }
  func.func @transform_6(%arg0: i32) -> (i32, i32, i32) {
    %c0_i32 = arith.constant 0 : i32
    %c0_i32_0 = arith.constant 0 : i32
    %c0_i32_1 = arith.constant 0 : i32
    %c0_i32_2 = arith.constant 0 : i32
    return %c0_i32, %c0_i32_0, %c0_i32_1 : i32, i32, i32
  }
}

</mosaic_0001>

<bundles_post_ra>
// kernel: _lambda_.1
= control target key start
LH: loop header
LB: loop body
LE: loop exit
PB: predicated region body
PF: predicated region fallthrough
CT: control target
= control target key end

     0   :  { %s2194_s21 = smov 0   ;;  %s2941_s0 = inlined_call_operand.vmem [shape: s32[8,1], index: 0, kind: input, shape index: {}]   ;;  %s2942_s1 = inlined_call_operand.vmem [shape: f32[12,8,384], index: 1, kind: input, shape index: {}]   ;;  %s2943_s2 = inlined_call_operand.vmem [shape: f32[12,8,384], index: 2, kind: input, shape index: {}]   ;;  %s2944_s3 = inlined_call_operand.vmem [shape: bf16[2,128,384], index: 3, kind: input, shape index: {}]   ;;  %s2945_s4 = inlined_call_operand.vmem [shape: f32[2,1,384], index: 4, kind: input, shape index: {}]   ;;  %s2946_s5 = inlined_call_operand.vmem [shape: f32[2,8,128], index: 5, kind: input, shape index: {}]   ;;  %s2947_s6 = inlined_call_operand.vmem [shape: f32[2,8,128], index: 6, kind: output, shape index: {}]  }
   0x1 LB: > { %s2200_s22 = sadd.s32 4294967295, %s2154_s21   ;;  %p1613_p0 = scmp.ge.s32.totalorder %s2154_s21, 1  ;;  %s2154_s21 = sphi %s2194_s21, %s16_s21  }
   0x2   : > { %p225_p1 = scmp.lt.s32.totalorder %s2154_s21, 4 }
   0x4   : > { %p226_p2 = pnand %p1613_p0, %p225_p1 }
   0x6   : > { %229 = sbr.rel (%p226_p2) target bundleno = 1153 (0x481), region = 44 }
   0xd   : > { %s2205_s23 = sshll.u32 %s2200_s22, 2  ;;  %s265_s24 = ssub.s32 2, %s2200_s22 }
   0xe   : > { %p259_p3 = scmp.lt.s32.totalorder %s2205_s23, 11  ;;  %s1616_s25 = sshll.u32 %s265_s24, 2 }
   0xf   : > { %p267_p4 = scmp.lt.s32.totalorder %s1616_s25, 11  ;;  %p1618_p5 = scmp.ne.s32.totalorder %s2200_s22, 0 }
  0x10   : > { %s260_s26 = scalar_select %p259_p3, %s2205_s23, 11 }
  0x11   : > { %s3007_s25 = smov (!%p267_p4, %s1616_s25), 11  ;;  %278 = sbr.rel (%p1618_p5) target bundleno = 24 (0x18), region = 48 }
  0x12   : > { %s1972_s27 = smul.u32 24, %s260_s26  ;;  %v279_v0 = vld [vmem:[%s2946_s5] sm:$0xff] (!%p1618_p5)  ;;  %v1619_v1 = vld [vmem:[%s2946_s5 + $0x8] sm:$0xff] (!%p1618_p5) }
  0x13   : > { %s1973_s28 = smul.u32 24, %s3007_s25  ;;  %280 = vst [vmem:[#allocation2] sm:$0xff] (!%p1618_p5), %v279_v0  ;;  %283 = vst [vmem:[#allocation3] sm:$0xff] (!%p1618_p5), %v1619_v1 }
  0x14   : > { %s2213_s7 = scalar_lea.vmem %s2942_s1, %s1972_s27 }
  0x15   : > { %s2218_s10 = scalar_lea.vmem %s2943_s2, %s1973_s28 }
  0x18 PF: > { %v2230_v2 = vld [vmem:[%s2944_s3 + $0x4] ss:$12 sps:$4 sm:$0xff]   ;;  %v2235_v3 = vld [vmem:[%s2944_s3] ss:$12 sps:$4 sm:$0xff]   ;;  %v2950_v4 = vmov 0.0   ;;  %v2948_v5 = vmov 0   ;;  %v856_v35 = vstv %s2205_s23 }
  0x19   : > { %1812 = vmatprep.subr.bf16.mxu1 %v2950_v4  ;;  %537 = vmatprep.mubr.bf16.mxu0 %v2948_v5  ;;  %v2243_v6 = vld [vmem:[%s2944_s3 + $0x1c] ss:$12 sps:$4 sm:$0xff]   ;;  %vm2158_vm0 = vmmov 0   ;;  %v2251_v7 = vld [vmem:[%s2944_s3 + $0x18] ss:$12 sps:$4 sm:$0xff]   ;;  %s356_s9 = ssub.s32 11, %s2205_s23 }
  0x1a   : > { %505 = vmatprep.subr.bf16.mxu0 %v2230_v2  ;;  %1828 = vmatprep.mubr.msk.bf16.mxu1 %vm2158_vm0, %v2950_v4  ;;  %v2258_v8 = vld [vmem:[%s2944_s3 + $0x34] ss:$12 sps:$4 sm:$0xff]   ;;  %v2265_v9 = vld [vmem:[%s2944_s3 + $0x30] ss:$12 sps:$4 sm:$0xff]   ;;  %v2271_v10 = vld [vmem:[%s2944_s3 + $0x4c] ss:$12 sps:$4 sm:$0xff]   ;;  %v864_v36 = vstv %s356_s9 }
  0x1b   : > { %506 = vmatpush1.bf16.msra.mxu0 %v2235_v3  ;;  %1985 = vset.pattern.permute.xlu0 %v2948_v5  ;;  %v2276_v11 = vld [vmem:[%s2944_s3 + $0x8] ss:$12 sps:$4 sm:$0xff]   ;;  %v2288_v13 = vld [vmem:[%s2944_s3 + $0x64] ss:$12 sps:$4 sm:$0xff]   ;;  %v2294_v14 = vld [vmem:[%s2944_s3 + $0x20] ss:$12 sps:$4 sm:$0xff]  }
  0x1c   : > { %507 = vmatprep.subr.bf16.mxu0 %v2243_v6  ;;  %1986 = vset.pattern.permute.xlu1 %v2948_v5  ;;  %v2282_v12 = vld [vmem:[%s2944_s3 + $0x48] ss:$12 sps:$4 sm:$0xff]   ;;  %v2301_v15 = vld [vmem:[%s2944_s3 + $0x60] ss:$12 sps:$4 sm:$0xff]   ;;  %v2313_v17 = vld [vmem:[%s2944_s3 + $0x38] ss:$12 sps:$4 sm:$0xff]  }
  0x1d   : > { %1813 = vmatpush3.bf16.msra.mxu1 %v2276_v11  ;;  %v2307_v16 = vld [vmem:[%s2944_s3 + $0x7c] ss:$12 sps:$4 sm:$0xff]   ;;  %v2319_v18 = vld [vmem:[%s2944_s3 + $0x78] ss:$12 sps:$4 sm:$0xff]   ;;  %v2325_v19 = vld [vmem:[%s2944_s3 + $0x94] ss:$12 sps:$4 sm:$0xff]  }
  0x1e   : > { %1814 = vmatprep.subr.bf16.mxu1 %v2950_v4  ;;  %2976 = vst [vmem:[#allocation4_spill] sm:$0xff] %v2319_v18  ;;  %2977 = vst [vmem:[#allocation5_spill] sm:$0xff] %v2325_v19  ;;  %v2332_v20 = vld [vmem:[%s2944_s3 + $0x50] ss:$12 sps:$4 sm:$0xff]   ;;  %v2344_v22 = vld [vmem:[%s2944_s3 + $0xac] ss:$12 sps:$4 sm:$0xff]  }
  0x1f   : > { %508 = vmatpush1.bf16.msra.mxu0 %v2251_v7  ;;  %v2339_v21 = vld [vmem:[%s2944_s3 + $0x90] ss:$12 sps:$4 sm:$0xff]   ;;  %2979 = vst [vmem:[#allocation7_spill] sm:$0xff] %v2344_v22  ;;  %v2351_v23 = vld [vmem:[%s2944_s3 + $0x68] ss:$12 sps:$4 sm:$0xff]   ;;  %v2359_v25 = vld [vmem:[#allocation2] sm:$0xff] }
  0x20   : > { %509 = vmatprep.subr.bf16.mxu0 %v2258_v8  ;;  %2978 = vst [vmem:[#allocation6_spill] sm:$0xff] %v2339_v21  ;;  %v2356_v24 = vld [vmem:[%s2944_s3 + $0xa8] ss:$12 sps:$4 sm:$0xff]   ;;  %v2365_v26 = vld [vmem:[%s2944_s3 + $0xc4] ss:$12 sps:$4 sm:$0xff]   ;;  %v360_v28 = vpack.c.bf16 %v2359_v25, %v2359_v25  ;;  %s1102_s19 = sadd.s32 2, %s2205_s23 }
  0x21   : > { %1815 = vmatpush3.bf16.msra.mxu1 %v2294_v14  ;;  %2980 = vst [vmem:[#allocation8_spill] sm:$0xff] %v2356_v24  ;;  %2981 = vst [vmem:[#allocation9_spill] sm:$0xff] %v2365_v26  ;;  %v2372_v27 = vld [vmem:[%s2944_s3 + $0x80] ss:$12 sps:$4 sm:$0xff]   ;;  %v2386_v30 = vld [vmem:[%s2944_s3 + $0xdc] ss:$12 sps:$4 sm:$0xff]   ;;  %v1316_v42 = vstv %s1102_s19 }
  0x22   : > { %1816 = vmatprep.subr.bf16.mxu1 %v2950_v4  ;;  %2982 = vst [vmem:[#allocation10_spill] sm:$0xff] %v2372_v27  ;;  %v2381_v29 = vld [vmem:[%s2944_s3 + $0xc0] ss:$12 sps:$4 sm:$0xff]   ;;  %v2393_v31 = vld [vmem:[%s2944_s3 + $0x98] ss:$12 sps:$4 sm:$0xff]   ;;  %s1332_s29 = sadd.s32 3, %s2205_s23 }
  0x23   : > { %510 = vmatpush1.bf16.msra.mxu0 %v2265_v9  ;;  %2983 = vst [vmem:[#allocation11_spill] sm:$0xff] %v2393_v31  ;;  %v2400_v32 = vld [vmem:[%s2944_s3 + $0xd8] ss:$12 sps:$4 sm:$0xff]   ;;  %v2406_v33 = vld [vmem:[%s2944_s3 + $0xf4] ss:$12 sps:$4 sm:$0xff]   ;;  %v1545_v47 = vstv %s1332_s29  ;;  %v2536_v60 = vld [vmem:[#allocation3] sm:$0xff] }
  0x24   : > { %511 = vmatprep.subr.bf16.mxu0 %v2271_v10  ;;  %v2414_v34 = vld [vmem:[%s2944_s3 + $0xb0] ss:$12 sps:$4 sm:$0xff]   ;;  %v2421_v37 = vld [vmem:[%s2941_s0] sm:$0xff]  ;;  %v2435_v39 = vld [vmem:[%s2944_s3 + $0x10c] ss:$12 sps:$4 sm:$0xff]   ;;  %v610_v62 = vpack.c.bf16 %v2536_v60, %v2536_v60  ;;  %s872_s24 = sadd.s32 1, %s2205_s23 }
  0x25   : > { %1817 = vmatpush3.bf16.msra.mxu1 %v2313_v17  ;;  %2984 = vst [vmem:[#allocation12_spill] sm:$0xff] %v2414_v34  ;;  %v2428_v38 = vld [vmem:[%s2944_s3 + $0xf0] ss:$12 sps:$4 sm:$0xff]   ;;  %vm857_vm1 = vcmp.lt.s32.totalorder %v856_v35, %v2421_v37  ;;  %v2441_v40 = vld [vmem:[%s2944_s3 + $0xc8] ss:$12 sps:$4 sm:$0xff]   ;;  %vm865_vm2 = vcmp.lt.s32.totalorder %v864_v36, %v2421_v37  ;;  %vm1317_vm3 = vcmp.lt.s32.totalorder %v1316_v42, %v2421_v37  ;;  %s873_s25 = ssub.s32 10, %s2205_s23  ;;  %v1086_v1 = vstv %s872_s24 }
  0x26   : > { %1818 = vmatprep.subr.bf16.mxu1 %v2950_v4  ;;  %v858_v41 = vsel %vm857_vm1, 1, %v2948_v5  ;;  %v2451_v43 = vld [vmem:[%s2944_s3 + $0x108] ss:$12 sps:$4 sm:$0xff]   ;;  %v866_v44 = vsel %vm865_vm2, 1, %v2948_v5  ;;  %v2458_v45 = vld [vmem:[%s2944_s3 + $0x124] ss:$12 sps:$4 sm:$0xff]   ;;  %vm1546_vm4 = vcmp.lt.s32.totalorder %v1545_v47, %v2421_v37  ;;  %vm1087_vm5 = vcmp.lt.s32.totalorder %v1086_v1, %v2421_v37 }
  0x27   : > { %512 = vmatpush1.bf16.msra.mxu0 %v2282_v12  ;;  %860 = vperm.xlu0 %1985, %v858_v41   ;;  %v2464_v46 = vld [vmem:[%s2944_s3 + $0xe0] ss:$12 sps:$4 sm:$0xff]   ;;  %v1318_v49 = vsel %vm1317_vm3, 1, %v2948_v5  ;;  %v2481_v50 = vld [vmem:[%s2944_s3 + $0x13c] ss:$12 sps:$4 sm:$0xff]   ;;  %v1547_v53 = vsel %vm1546_vm4, 1, %v2948_v5 }
  0x28   : > { %513 = vmatprep.subr.bf16.mxu0 %v2288_v13  ;;  %v2474_v48 = vld [vmem:[%s2944_s3 + $0x120] ss:$12 sps:$4 sm:$0xff]   ;;  %v2487_v51 = vld [vmem:[%s2944_s3 + $0xf8] ss:$12 sps:$4 sm:$0xff]   ;;  %v2508_v55 = vld [vmem:[%s2944_s3 + $0x110] ss:$12 sps:$4 sm:$0xff]  }
  0x29   : > { %1819 = vmatpush3.bf16.msra.mxu1 %v2332_v20  ;;  %v2495_v52 = vld [vmem:[%s2944_s3 + $0x138] ss:$12 sps:$4 sm:$0xff]   ;;  %v2502_v54 = vld [vmem:[%s2944_s3 + $0x154] ss:$12 sps:$4 sm:$0xff]   ;;  %v2515_v56 = vld [vmem:[%s2944_s3 + $0x150] ss:$12 sps:$4 sm:$0xff]  }
  0x2a   : > { %1820 = vmatprep.subr.bf16.mxu1 %v2950_v4  ;;  %v2521_v57 = vld [vmem:[%s2944_s3 + $0x16c] ss:$12 sps:$4 sm:$0xff]   ;;  %v2527_v58 = vld [vmem:[%s2944_s3 + $0x128] ss:$12 sps:$4 sm:$0xff]   ;;  %v2563_v0 = vld [vmem:[%s2944_s3 + $0x170] ss:$12 sps:$4 sm:$0xff]  }
  0x2b   : > { %514 = vmatpush1.bf16.msra.mxu0 %v2301_v15  ;;  %868 = vperm.xlu0 %1985, %v866_v44   ;;  %v2534_v59 = vld [vmem:[%s2944_s3 + $0x168] ss:$12 sps:$4 sm:$0xff]   ;;  %v2543_v61 = vld [vmem:[%s2944_s3 + $0x140] ss:$12 sps:$4 sm:$0xff]   ;;  %v2553_v63 = vld [vmem:[%s2944_s3 + $0x158] ss:$12 sps:$4 sm:$0xff]  }
  0x2c   : > { %515 = vmatprep.subr.bf16.mxu0 %v2307_v16  ;;  %s1103_s26 = ssub.s32 9, %s2205_s23  ;;  %v1088_v35 = vsel %vm1087_vm5, 1, %v2948_v5  ;;  %s1333_s27 = ssub.s32 8, %s2205_s23  ;;  %v350_v1 = vld [vmem:[%s2945_s4] sm:$0x7] }
  0x2d   : > { %1821 = vmatpush3.bf16.msra.mxu1 %v2351_v23  ;;  %v1324_v36 = vstv %s1103_s26  ;;  %1090 = vperm.xlu1 %1986, %v1088_v35   ;;  %v1553_v42 = vstv %s1333_s27  ;;  %p1736_p6 = scmp.ne.s32.totalorder %s2200_s22, 2 }
  0x2e   : > { %1822 = vmatprep.subr.bf16.mxu1 %v2950_v4  ;;  %vm1325_vm7 = vcmp.lt.s32.totalorder %v1324_v36, %v2421_v37  ;;  %vm1554_vm8 = vcmp.lt.s32.totalorder %v1553_v42, %v2421_v37  ;;  %v357_v36 = vld [vmem:[%s2213_s7] sm:$0xff] }
  0x2f   : > { %516 = vmatpush1.bf16.msra.mxu0 %v2319_v18  ;;  %1320 = vperm.xlu0 %1985, %v1318_v49   ;;  %v1326_v44 = vsel %vm1325_vm7, 1, %v2948_v5  ;;  %v1555_v47 = vsel %vm1554_vm8, 1, %v2948_v5  ;;  %v362_v49 = vlaneseq }
  0x30   : > { %517 = vmatprep.subr.bf16.mxu0 %v2325_v19 }
  0x31   : > { %1823 = vmatpush3.bf16.msra.mxu1 %v2372_v27 }
  0x32   : > { %1824 = vmatprep.subr.bf16.mxu1 %v2950_v4 }
  0x33   : > { %518 = vmatpush1.bf16.msra.mxu0 %v2339_v21  ;;  %1549 = vperm.xlu0 %1985, %v1547_v53   ;;  %v2613_v53 = vshrl.u32 %v362_v49, 7 }
  0x34   : > { %519 = vmatprep.subr.bf16.mxu0 %v2344_v22 }
  0x35   : > { %1825 = vmatpush3.bf16.msra.mxu1 %v2393_v31  ;;  %v368_v35 = vsub.s32 1, %v2613_v53 }
  0x36   : > { %1826 = vmatprep.subr.bf16.mxu1 %v2950_v4 }
  0x37   : > { %520 = vmatpush1.bf16.msra.mxu0 %v2356_v24  ;;  %v2624_v49 = vrot.slane %v350_v1, %v368_v35 }
  0x38   : > { %755 = vmatprep.subr.bf16.mxu0 %v2365_v26 }
  0x39   : > { %1827 = vmatpush3.bf16.msra.mxu1 %v2414_v34  ;;  %2986 = vst [vmem:[#allocation14_spill] sm:$0xff] %v2624_v49 }
  0x3a   : > { %538 = vmatmul.mubr.bf16.vlgmr.msra.gmra.mrb[0].mxu0 %v360_v28  ;;  %1832 = vmatprep.subr.bf16.mxu1 %v2950_v4 }
  0x3b   : > { %756 = vmatpush1.bf16.msra.mxu0 %v2381_v29  ;;  %787 = vmatprep.mubr.bf16.mxu0 %v2948_v5 }
  0x3c   : > { %757 = vmatprep.subr.bf16.mxu0 %v2386_v30  ;;  %1829 = vmatmul.mubr.bf16.vlgmr.msra.gmra.mrb[0].mxu1 %v360_v28  ;;  %v1094_v28 = vstv %s873_s25 }
  0x3d   : > { %1833 = vmatpush3.bf16.msra.mxu1 %v2441_v40  ;;  %1848 = vmatprep.mubr.msk.bf16.mxu1 %vm2158_vm0, %v2950_v4  ;;  %vm1095_vm6 = vcmp.lt.s32.totalorder %v1094_v28, %v2421_v37 }
  0x3e   : > { %1834 = vmatprep.subr.bf16.mxu1 %v2950_v4  ;;  %v1096_v41 = vsel %vm1095_vm6, 1, %v2948_v5 }
  0x3f   : > { %758 = vmatpush1.bf16.msra.mxu0 %v2400_v32  ;;  %1098 = vperm.xlu1 %1986, %v1096_v41  }
  0x40   : > { %759 = vmatprep.subr.bf16.mxu0 %v2406_v33 }
  0x41   : > { %1835 = vmatpush3.bf16.msra.mxu1 %v2464_v46 }
  0x42   : > { %1836 = vmatprep.subr.bf16.mxu1 %v2950_v4 }
  0x43   : > { %760 = vmatpush1.bf16.msra.mxu0 %v2428_v38  ;;  %1328 = vperm.xlu1 %1986, %v1326_v44  }
  0x44   : > { %761 = vmatprep.subr.bf16.mxu0 %v2435_v39 }
  0x45   : > { %1837 = vmatpush3.bf16.msra.mxu1 %v2487_v51 }
  0x46   : > { %1838 = vmatprep.subr.bf16.mxu1 %v2950_v4 }
  0x47   : > { %762 = vmatpush1.bf16.msra.mxu0 %v2451_v43  ;;  %1557 = vperm.xlu1 %1986, %v1555_v47  }
  0x48   : > { %763 = vmatprep.subr.bf16.mxu0 %v2458_v45 }
  0x49   : > { %1839 = vmatpush3.bf16.msra.mxu1 %v2508_v55 }
  0x4a   : > { %1840 = vmatprep.subr.bf16.mxu1 %v2950_v4 }
  0x4b   : > { %764 = vmatpush1.bf16.msra.mxu0 %v2474_v48 }
  0x4c   : > { %765 = vmatprep.subr.bf16.mxu0 %v2481_v50 }
  0x4d   : > { %1841 = vmatpush3.bf16.msra.mxu1 %v2527_v58 }
  0x4e   : > { %1842 = vmatprep.subr.bf16.mxu1 %v2950_v4 }
  0x4f   : > { %766 = vmatpush1.bf16.msra.mxu0 %v2495_v52 }
  0x50   : > { %767 = vmatprep.subr.bf16.mxu0 %v2502_v54 }
  0x51   : > { %1843 = vmatpush3.bf16.msra.mxu1 %v2543_v61 }
  0x52   : > { %1844 = vmatprep.subr.bf16.mxu1 %v2950_v4 }
  0x53   : > { %768 = vmatpush1.bf16.msra.mxu0 %v2515_v56 }
  0x54   : > { %769 = vmatprep.subr.bf16.mxu0 %v2521_v57 }
  0x55   : > { %1845 = vmatpush3.bf16.msra.mxu1 %v2553_v63 }
  0x56   : > { %1846 = vmatprep.subr.bf16.mxu1 %v2950_v4 }
  0x57   : > { %770 = vmatpush1.bf16.msra.mxu0 %v2534_v59 }
  0x58   : > { %879 = vmatprep.subr.bf16.mxu0 %v2230_v2 }
  0x59   : > { %1847 = vmatpush3.bf16.msra.mxu1 %v2563_v0 }
  0x5a   : > { %788 = vmatmul.mubr.bf16.vlgmr.msra.gmra.mrb[4].mxu0 %v610_v62  ;;  %1852 = vmatprep.subr.bf16.mxu1 %v2950_v4 }
  0x5b   : > { %880 = vmatpush1.bf16.msra.mxu0 %v2235_v3  ;;  %911 = vmatprep.mubr.bf16.mxu0 %v2948_v5 }
  0x5c   : > { %881 = vmatprep.subr.bf16.mxu0 %v2243_v6  ;;  %1849 = vmatmul.mubr.bf16.vlgmr.msra.gmra.mrb[4].mxu1 %v610_v62  ;;  %v364_v62 = vsub.s32 0, %v2613_v53 }
  0x5d   : > { %1853 = vmatpush3.bf16.msra.mxu1 %v2276_v11  ;;  %1868 = vmatprep.mubr.msk.bf16.mxu1 %vm2158_vm0, %v2950_v4 }
  0x5e   : > { %1854 = vmatprep.subr.bf16.mxu1 %v2950_v4  ;;  %v2619_v28 = vrot.slane %v350_v1, %v364_v62 }
  0x5f   : > { %882 = vmatpush1.bf16.msra.mxu0 %v2251_v7 }
  0x60   : > { %883 = vmatprep.subr.bf16.mxu0 %v2258_v8  ;;  %2985 = vst [vmem:[#allocation13_spill] sm:$0xff] %v2619_v28 }
  0x61   : > { %1855 = vmatpush3.bf16.msra.mxu1 %v2294_v14 }
  0x62   : > { %1856 = vmatprep.subr.bf16.mxu1 %v2950_v4 }
  0x63   : > { %884 = vmatpush1.bf16.msra.mxu0 %v2265_v9 }
  0x64   : > { %885 = vmatprep.subr.bf16.mxu0 %v2271_v10 }
  0x65   : > { %1857 = vmatpush3.bf16.msra.mxu1 %v2313_v17 }
  0x66   : > { %1858 = vmatprep.subr.bf16.mxu1 %v2950_v4 }
  0x67   : > { %886 = vmatpush1.bf16.msra.mxu0 %v2282_v12 }
  0x68   : > { %887 = vmatprep.subr.bf16.mxu0 %v2288_v13 }
  0x69   : > { %1859 = vmatpush3.bf16.msra.mxu1 %v2332_v20 }
  0x6a   : > { %1860 = vmatprep.subr.bf16.mxu1 %v2950_v4 }
  0x6b   : > { %888 = vmatpush1.bf16.msra.mxu0 %v2301_v15 }
  0x6c   : > { %889 = vmatprep.subr.bf16.mxu0 %v2307_v16 }
  0x6d   : > { %1861 = vmatpush3.bf16.msra.mxu1 %v2351_v23 }
  0x6e   : > { %1862 = vmatprep.subr.bf16.mxu1 %v2950_v4 }
  0x6f   : > { %890 = vmatpush1.bf16.msra.mxu0 %v2319_v18 }
  0x70   : > { %891 = vmatprep.subr.bf16.mxu0 %v2325_v19 }
  0x71   : > { %1863 = vmatpush3.bf16.msra.mxu1 %v2372_v27 }
  0x72   : > { %1864 = vmatprep.subr.bf16.mxu1 %v2950_v4 }
  0x73   : > { %892 = vmatpush1.bf16.msra.mxu0 %v2339_v21 }
  0x74   : > { %893 = vmatprep.subr.bf16.mxu0 %v2344_v22 }
  0x75   : > { %1865 = vmatpush3.bf16.msra.mxu1 %v2393_v31 }
  0x76   : > { %1866 = vmatprep.subr.bf16.mxu1 %v2950_v4 }
  0x77   : > { %894 = vmatpush1.bf16.msra.mxu0 %v2356_v24 }
  0x78   : > { %985 = vmatprep.subr.bf16.mxu0 %v2365_v26 }
  0x79   : > { %1867 = vmatpush3.bf16.msra.mxu1 %v2414_v34  ;;  %v358_v34 = vld [vmem:[%s2213_s7 + $0x8] sm:$0xff] }
  0x7a   : > { %1872 = vmatprep.subr.bf16.mxu1 %v2950_v4 }
 0x10d   : > { %v539_v37 = vpop.f32.mrb[0].mxu0 }
 0x10e   : > { %v540_v41 = vadd.f32 %v539_v37, %v2619_v28  ;;  %v541_v42 = vpop.f32.mrb[1].mxu0 }
 0x10f   : > { %v543_v44 = vpop.f32.mrb[2].mxu0  ;;  %v542_v26 = vadd.f32 %v541_v42, %v2624_v49  ;;  %v580_v24 = vpop.f32.mrb[0].mxu1 }
 0x110   : > { %v586_v47 = vadd.f32 %v540_v41, %v357_v36  ;;  %v544_v5 = vpop.f32.mrb[3].mxu0  ;;  %v1830_v22 = vpop.f32.mrb[1].mxu1  ;;  %v372_v36 = vsub.s32 2, %v2613_v53 }
 0x111   : > { %v593_v31 = vadd.f32 %v542_v26, %v358_v34  ;;  %v583_v21 = vpop.f32.mrb[2].mxu1  ;;  %v1680_v34 = vld [vmem:[%s2218_s10 + $0x48] sm:$0xff] }
 0x112   : > { %v1678_v4 = vmul.f32 -1.442695, %v586_v47  ;;  %v1831_v19 = vpop.f32.mrb[3].mxu1  ;;  %v2629_v5 = vrot.slane %v350_v1, %v372_v36 }
 0x113   : > { %v1679_v27 = vmul.f32 -1.442695, %v593_v31  ;;  %v359_v19 = vld [vmem:[%s2213_s7 + $0x10] sm:$0xff] }
 0x114   : > { %2051 = vpow2.f32 %v1678_v4  ;;  %2987 = vst [vmem:[#allocation15_spill] sm:$0xff] %v2629_v5  ;;  %v1652_v4 = vld [vmem:[%s2945_s4 + $0x3] sm:$0x7]  ;;  %v581_v22 = vadd.f32 %v580_v24, %v2629_v5 }
 0x115   : > { %2053 = vpow2.f32 %v1679_v27  ;;  %v2635_v26 = vrot.slane %v1652_v4, %v364_v62 }
 0x11e   : > { %v2052_v37 = vpop.eup %2051 }
 0x11f   : > { %v590_v28 = vadd.f32 1.0, %v2052_v37  ;;  %v2054_v41 = vpop.eup %2053  ;;  %v2640_v37 = vrot.slane %v1652_v4, %v368_v35  ;;  %v861_v35 = vpop.permute.xlu0 %860 }
 0x120   : > { %v597_v42 = vadd.f32 1.0, %v2054_v41  ;;  %vm862_vm9 = vcmp.eq.s32.totalorder %v861_v35, 1 }
 0x121   : > { %2055 = vrcp.f32 %v590_v28 }
 0x12b   : > { %v2056_v21 = vpop.eup %2055 }
 0x12c   : > { %v600_v31 = vmul.f32 %v2056_v21, %v581_v22  ;;  %v1681_v22 = vld [vmem:[%s2218_s10 + $0x50] sm:$0xff] }
 0x12d   : > { %v789_v27 = vpop.f32.mrb[4].mxu0 }
 0x12e   : > { %v601_v53 = vadd.f32 %v600_v31, %v359_v19  ;;  %v790_v1 = vadd.f32 %v789_v27, %v2635_v26  ;;  %v791_v28 = vpop.f32.mrb[5].mxu0 }
 0x12f   : > { %v793_v44 = vpop.f32.mrb[6].mxu0  ;;  %v792_v5 = vadd.f32 %v791_v28, %v2640_v37  ;;  %v830_v21 = vpop.f32.mrb[4].mxu1 }
 0x130   : > { %2057 = vtanh.f32 %v601_v53  ;;  %v836_v47 = vadd.f32 %v1680_v34, %v790_v1  ;;  %v794_v24 = vpop.f32.mrb[7].mxu0  ;;  %v1850_v49 = vpop.f32.mrb[5].mxu1 }
 0x131   : > { %2059 = vrcp.f32 %v597_v42  ;;  %v843_v18 = vadd.f32 %v1681_v22, %v792_v5  ;;  %v833_v41 = vpop.f32.mrb[6].mxu1  ;;  %v2650_v5 = vrot.slane %v1652_v4, %v372_v36  ;;  %v2989_v24 = vmov 0  }
 0x132   : > { %v1707_v62 = vmul.f32 -1.442695, %v836_v47  ;;  %v1851_v19 = vpop.f32.mrb[7].mxu1 }
 0x133   : > { %v1708_v53 = vmul.f32 -1.442695, %v843_v18  ;;  %v2988_v18 = vmov 0.0  }
 0x134   : > { %2061 = vpow2.f32 %v1707_v62  ;;  %v1682_v62 = vld [vmem:[%s2218_s10 + $0x58] sm:$0xff] }
 0x135   : > { %2063 = vpow2.f32 %v1708_v53  ;;  %v869_v53 = vpop.permute.xlu0 %868 }
 0x136   : > { %vm870_vm10 = vcmp.eq.s32.totalorder %v869_v53, 1 }
 0x13a   : > { %v2058_v31 = vpop.eup %2057 }
 0x13b   : > { %v603_v27 = vsub.f32 %v2359_v25, %v2058_v31  ;;  %v2060_v44 = vpop.eup %2059 }
 0x13d   : > { %v604_v34 = vmul.f32 %v2060_v44, %v603_v27 }
 0x13e   : > { %v2062_v1 = vpop.eup %2061 }
 0x13f   : > { %v840_v42 = vadd.f32 1.0, %v2062_v1  ;;  %v605_v47 = vadd.f32 %v2058_v31, %v604_v34  ;;  %v2064_v36 = vpop.eup %2063 }
 0x140   : > { %v847_v41 = vadd.f32 1.0, %v2064_v36 }
 0x141   : > { %2065 = vrcp.f32 %v840_v42  ;;  %v2646_v28 = vsel %vm862_vm9, %v605_v47, %v2359_v25  ;;  %v831_v25 = vadd.f32 %v830_v21, %v2650_v5  ;;  %v2999_v42 = vld [vmem:[#allocation13_spill] sm:$0xff] }
 0x142   : > { %v878_v49 = vpack.c.bf16 %v2646_v28, %v2646_v28 }
 0x144   : > { %912 = vmatmul.mubr.bf16.vlgmr.msra.gmra.mrb[8].mxu0 %v878_v49  ;;  %1869 = vmatmul.mubr.bf16.vlgmr.msra.gmra.mrb[8].mxu1 %v878_v49 }
 0x145   : > { %986 = vmatpush1.bf16.msra.mxu0 %v2381_v29  ;;  %1873 = vmatpush3.bf16.msra.mxu1 %v2441_v40 }
 0x146   : > { %987 = vmatprep.subr.bf16.mxu0 %v2386_v30  ;;  %1874 = vmatprep.subr.bf16.mxu1 %v2988_v18 }
 0x147   : > { %1017 = vmatprep.mubr.bf16.mxu0 %v2989_v24  ;;  %1888 = vmatprep.mubr.msk.bf16.mxu1 %vm2158_vm0, %v2988_v18 }
 0x149   : > { %988 = vmatpush1.bf16.msra.mxu0 %v2400_v32  ;;  %1875 = vmatpush3.bf16.msra.mxu1 %v2464_v46 }
 0x14a   : > { %989 = vmatprep.subr.bf16.mxu0 %v2406_v33  ;;  %1876 = vmatprep.subr.bf16.mxu1 %v2988_v18 }
 0x14b   : > { %v2066_v4 = vpop.eup %2065 }
 0x14c   : > { %v850_v22 = vmul.f32 %v2066_v4, %v831_v25 }
 0x14d   : > { %990 = vmatpush1.bf16.msra.mxu0 %v2428_v38  ;;  %1877 = vmatpush3.bf16.msra.mxu1 %v2487_v51 }
 0x14e   : > { %v851_v19 = vadd.f32 %v1682_v62, %v850_v22  ;;  %991 = vmatprep.subr.bf16.mxu0 %v2435_v39  ;;  %1878 = vmatprep.subr.bf16.mxu1 %v2988_v18 }
 0x150   : > { %2067 = vtanh.f32 %v851_v19 }
 0x151   : > { %992 = vmatpush1.bf16.msra.mxu0 %v2451_v43  ;;  %1879 = vmatpush3.bf16.msra.mxu1 %v2508_v55  ;;  %2069 = vrcp.f32 %v847_v41 }
 0x152   : > { %993 = vmatprep.subr.bf16.mxu0 %v2458_v45  ;;  %1880 = vmatprep.subr.bf16.mxu1 %v2988_v18 }
 0x155   : > { %994 = vmatpush1.bf16.msra.mxu0 %v2474_v48  ;;  %1881 = vmatpush3.bf16.msra.mxu1 %v2527_v58 }
 0x156   : > { %995 = vmatprep.subr.bf16.mxu0 %v2481_v50  ;;  %1882 = vmatprep.subr.bf16.mxu1 %v2988_v18 }
 0x159   : > { %996 = vmatpush1.bf16.msra.mxu0 %v2495_v52  ;;  %1883 = vmatpush3.bf16.msra.mxu1 %v2543_v61 }
 0x15a   : > { %v2068_v21 = vpop.eup %2067  ;;  %997 = vmatprep.subr.bf16.mxu0 %v2502_v54  ;;  %1884 = vmatprep.subr.bf16.mxu1 %v2988_v18 }
 0x15b   : > { %v853_v31 = vsub.f32 %v2536_v60, %v2068_v21  ;;  %v2070_v27 = vpop.eup %2069 }
 0x15d   : > { %998 = vmatpush1.bf16.msra.mxu0 %v2515_v56  ;;  %1885 = vmatpush3.bf16.msra.mxu1 %v2553_v63  ;;  %v854_v44 = vmul.f32 %v2070_v27, %v853_v31  ;;  %v1710_v27 = vld [vmem:[%s2213_s7 + $0x20] sm:$0xff] }
 0x15e   : > { %999 = vmatprep.subr.bf16.mxu0 %v2521_v57  ;;  %1886 = vmatprep.subr.bf16.mxu1 %v2988_v18 }
 0x15f   : > { %v855_v34 = vadd.f32 %v2068_v21, %v854_v44  ;;  %v3000_v21 = vld [vmem:[#allocation14_spill] sm:$0xff] }
 0x161   : > { %1000 = vmatpush1.bf16.msra.mxu0 %v2534_v59  ;;  %1887 = vmatpush3.bf16.msra.mxu1 %v2563_v0  ;;  %v2689_v35 = vsel %vm870_vm10, %v855_v34, %v2536_v60 }
 0x162   : > { %v984_v1 = vpack.c.bf16 %v2689_v35, %v2689_v35  ;;  %1109 = vmatprep.subr.bf16.mxu0 %v2230_v2  ;;  %1892 = vmatprep.subr.bf16.mxu1 %v2988_v18  ;;  %v2990_v2 = vld [vmem:[#allocation4_spill] sm:$0xff] }
 0x164   : > { %1018 = vmatmul.mubr.bf16.vlgmr.msra.gmra.mrb[12].mxu0 %v984_v1  ;;  %1889 = vmatmul.mubr.bf16.vlgmr.msra.gmra.mrb[12].mxu1 %v984_v1 }
 0x165   : > { %1110 = vmatpush1.bf16.msra.mxu0 %v2235_v3  ;;  %1893 = vmatpush3.bf16.msra.mxu1 %v2276_v11  ;;  %v2991_v3 = vld [vmem:[#allocation10_spill] sm:$0xff]  ;;  %v2997_v11 = vld [vmem:[#allocation12_spill] sm:$0xff] }
 0x166   : > { %1111 = vmatprep.subr.bf16.mxu0 %v2243_v6  ;;  %1894 = vmatprep.subr.bf16.mxu1 %v2988_v18  ;;  %v2992_v6 = vld [vmem:[#allocation5_spill] sm:$0xff] }
 0x167   : > { %1141 = vmatprep.mubr.bf16.mxu0 %v2989_v24  ;;  %1908 = vmatprep.mubr.msk.bf16.mxu1 %vm2158_vm0, %v2988_v18 }
 0x169   : > { %1112 = vmatpush1.bf16.msra.mxu0 %v2251_v7  ;;  %1895 = vmatpush3.bf16.msra.mxu1 %v2294_v14  ;;  %v2993_v7 = vld [vmem:[#allocation6_spill] sm:$0xff] }
 0x16a   : > { %1113 = vmatprep.subr.bf16.mxu0 %v2258_v8  ;;  %1896 = vmatprep.subr.bf16.mxu1 %v2988_v18  ;;  %v2994_v8 = vld [vmem:[#allocation11_spill] sm:$0xff] }
 0x16d   : > { %1114 = vmatpush1.bf16.msra.mxu0 %v2265_v9  ;;  %1897 = vmatpush3.bf16.msra.mxu1 %v2313_v17  ;;  %v2995_v9 = vld [vmem:[#allocation7_spill] sm:$0xff] }
 0x16e   : > { %1115 = vmatprep.subr.bf16.mxu0 %v2271_v10  ;;  %1898 = vmatprep.subr.bf16.mxu1 %v2988_v18  ;;  %v2996_v10 = vld [vmem:[#allocation8_spill] sm:$0xff] }
 0x171   : > { %1116 = vmatpush1.bf16.msra.mxu0 %v2282_v12  ;;  %1899 = vmatpush3.bf16.msra.mxu1 %v2332_v20  ;;  %v2998_v12 = vld [vmem:[#allocation9_spill] sm:$0xff] }
 0x172   : > { %1117 = vmatprep.subr.bf16.mxu0 %v2288_v13  ;;  %1900 = vmatprep.subr.bf16.mxu1 %v2988_v18  ;;  %v1709_v13 = vld [vmem:[%s2213_s7 + $0x18] sm:$0xff] }
 0x175   : > { %1118 = vmatpush1.bf16.msra.mxu0 %v2301_v15  ;;  %1901 = vmatpush3.bf16.msra.mxu1 %v2351_v23 }
 0x176   : > { %1119 = vmatprep.subr.bf16.mxu0 %v2307_v16  ;;  %1902 = vmatprep.subr.bf16.mxu1 %v2988_v18 }
 0x179   : > { %1120 = vmatpush1.bf16.msra.mxu0 %v2990_v2  ;;  %1903 = vmatpush3.bf16.msra.mxu1 %v2991_v3 }
 0x17a   : > { %1121 = vmatprep.subr.bf16.mxu0 %v2992_v6  ;;  %1904 = vmatprep.subr.bf16.mxu1 %v2988_v18 }
 0x17d   : > { %1122 = vmatpush1.bf16.msra.mxu0 %v2993_v7  ;;  %1905 = vmatpush3.bf16.msra.mxu1 %v2994_v8 }
 0x17e   : > { %1123 = vmatprep.subr.bf16.mxu0 %v2995_v9  ;;  %1906 = vmatprep.subr.bf16.mxu1 %v2988_v18 }
 0x181   : > { %1124 = vmatpush1.bf16.msra.mxu0 %v2996_v10  ;;  %1907 = vmatpush3.bf16.msra.mxu1 %v2997_v11 }
 0x182   : > { %1215 = vmatprep.subr.bf16.mxu0 %v2998_v12  ;;  %1912 = vmatprep.subr.bf16.mxu1 %v2988_v18 }
 0x217   : > { %v913_v15 = vpop.f32.mrb[8].mxu0  ;;  %v954_v60 = vpop.f32.mrb[8].mxu1 }
 0x218   : > { %v914_v47 = vadd.f32 %v913_v15, %v2999_v42  ;;  %v915_v49 = vpop.f32.mrb[9].mxu0  ;;  %v1870_v25 = vpop.f32.mrb[9].mxu1 }
 0x219   : > { %v917_v36 = vpop.f32.mrb[10].mxu0  ;;  %v957_v4 = vpop.f32.mrb[10].mxu1  ;;  %v916_v31 = vadd.f32 %v915_v49, %v3000_v21  ;;  %v3001_v25 = vld [vmem:[#allocation15_spill] sm:$0xff] }
 0x21a   : > { %v960_v62 = vadd.f32 %v1709_v13, %v914_v47  ;;  %v918_v22 = vpop.f32.mrb[11].mxu0  ;;  %v1871_v41 = vpop.f32.mrb[11].mxu1  ;;  %v955_v36 = vadd.f32 %v954_v60, %v3001_v25  ;;  %v1711_v13 = vld [vmem:[%s2213_s7 + $0x28] sm:$0xff] }
 0x21b   : > { %v967_v44 = vadd.f32 %v1710_v27, %v916_v31  ;;  %v1714_v22 = vld [vmem:[%s2218_s10 + $0x30] sm:$0xff] }
 0x21c   : > { %v1712_v19 = vmul.f32 -1.442695, %v960_v62 }
 0x21d   : > { %v1713_v53 = vmul.f32 -1.442695, %v967_v44 }
 0x21e   : > { %2071 = vpow2.f32 %v1712_v19 }
 0x21f   : > { %2073 = vpow2.f32 %v1713_v53 }
 0x228   : > { %v2072_v34 = vpop.eup %2071 }
 0x229   : > { %v964_v1 = vadd.f32 1.0, %v2072_v34  ;;  %v2074_v15 = vpop.eup %2073 }
 0x22a   : > { %v971_v19 = vadd.f32 1.0, %v2074_v15 }
 0x22b   : > { %2075 = vrcp.f32 %v964_v1 }
 0x235   : > { %v2076_v4 = vpop.eup %2075 }
 0x236   : > { %v974_v47 = vmul.f32 %v2076_v4, %v955_v36  ;;  %v1715_v4 = vld [vmem:[%s2218_s10 + $0x38] sm:$0xff] }
 0x237   : > { %v1019_v41 = vpop.f32.mrb[12].mxu0  ;;  %v1060_v42 = vpop.f32.mrb[12].mxu1 }
 0x238   : > { %v975_v62 = vadd.f32 %v1711_v13, %v974_v47  ;;  %v1020_v49 = vadd.f32 %v1019_v41, %v2635_v26  ;;  %v1021_v31 = vpop.f32.mrb[13].mxu0  ;;  %v1890_v27 = vpop.f32.mrb[13].mxu1 }
 0x239   : > { %v1023_v44 = vpop.f32.mrb[14].mxu0  ;;  %v1063_v34 = vpop.f32.mrb[14].mxu1  ;;  %v1022_v36 = vadd.f32 %v1021_v31, %v2640_v37 }
 0x23a   : > { %2077 = vtanh.f32 %v975_v62  ;;  %v1066_v53 = vadd.f32 %v1714_v22, %v1020_v49  ;;  %v1024_v1 = vpop.f32.mrb[15].mxu0  ;;  %v1891_v21 = vpop.f32.mrb[15].mxu1 }
 0x23b   : > { %2079 = vrcp.f32 %v971_v19  ;;  %v1073_v25 = vadd.f32 %v1715_v4, %v1022_v36  ;;  %v1091_v41 = vpop.permute.xlu1 %1090  ;;  %v2133_v36 = vld [vmem:[%s2944_s3 + $0x8] ss:$12 sps:$4 sm:$0xff]  }
 0x23c   : > { %v1717_v60 = vmul.f32 -1.442695, %v1066_v53  ;;  %vm1092_vm11 = vcmp.eq.s32.totalorder %v1091_v41, 1  ;;  %v2134_v4 = vld [vmem:[%s2944_s3 + $0x1c] ss:$12 sps:$4 sm:$0xff]  }
 0x23d   : > { %v1718_v47 = vmul.f32 -1.442695, %v1073_v25  ;;  %v2138_v41 = vld [vmem:[%s2944_s3 + $0x4c] ss:$12 sps:$4 sm:$0xff]  }
 0x23e   : > { %2081 = vpow2.f32 %v1717_v60  ;;  %v2131_v60 = vld [vmem:[%s2944_s3 + $0x4] ss:$12 sps:$4 sm:$0xff]  }
 0x23f   : > { %2083 = vpow2.f32 %v1718_v47  ;;  %v2137_v47 = vld [vmem:[%s2944_s3 + $0x30] ss:$12 sps:$4 sm:$0xff]  }
 0x244   : > { %v2078_v12 = vpop.eup %2077 }
 0x245   : > { %v977_v15 = vsub.f32 %v2646_v28, %v2078_v12  ;;  %v2080_v13 = vpop.eup %2079 }
 0x247   : > { %v978_v27 = vmul.f32 %v2080_v13, %v977_v15  ;;  %v2135_v15 = vld [vmem:[%s2944_s3 + $0x18] ss:$12 sps:$4 sm:$0xff]   ;;  %v2136_v13 = vld [vmem:[%s2944_s3 + $0x34] ss:$12 sps:$4 sm:$0xff]  }
 0x248   : > { %v2082_v44 = vpop.eup %2081 }
 0x249   : > { %v1070_v62 = vadd.f32 1.0, %v2082_v44  ;;  %v979_v22 = vadd.f32 %v2078_v12, %v978_v27  ;;  %v1061_v12 = vadd.f32 %v1060_v42, %v2650_v5  ;;  %v1099_v42 = vpop.permute.xlu1 %1098  ;;  %v2140_v27 = vld [vmem:[%s2944_s3 + $0x64] ss:$12 sps:$4 sm:$0xff]  }
 0x24a   : > { %vm1100_vm12 = vcmp.eq.s32.totalorder %v1099_v42, 1 }
 0x24b   : > { %2085 = vrcp.f32 %v1070_v62  ;;  %v2742_v21 = vsel %vm1092_vm11, %v979_v22, %v2646_v28  ;;  %v2084_v28 = vpop.eup %2083 }
 0x24c   : > { %v1108_v19 = vpack.c.bf16 %v2742_v21, %v2742_v21  ;;  %v1077_v31 = vadd.f32 1.0, %v2084_v28 }
 0x24e   : > { %1142 = vmatmul.mubr.bf16.vlgmr.msra.gmra.mrb[16].mxu0 %v1108_v19  ;;  %1909 = vmatmul.mubr.bf16.vlgmr.msra.gmra.mrb[16].mxu1 %v1108_v19  ;;  %v3004_v19 = vld [vmem:[#allocation14_spill] sm:$0xff] }
 0x24f   : > { %1216 = vmatpush1.bf16.msra.mxu0 %v2381_v29  ;;  %1913 = vmatpush3.bf16.msra.mxu1 %v2441_v40 }
 0x250   : > { %1217 = vmatprep.subr.bf16.mxu0 %v2386_v30  ;;  %1914 = vmatprep.subr.bf16.mxu1 %v2988_v18  ;;  %v1716_v30 = vld [vmem:[%s2218_s10 + $0x40] sm:$0xff] }
 0x251   : > { %1247 = vmatprep.mubr.bf16.mxu0 %v2989_v24  ;;  %1928 = vmatprep.mubr.msk.bf16.mxu1 %vm2158_vm0, %v2988_v18 }
 0x253   : > { %1218 = vmatpush1.bf16.msra.mxu0 %v2400_v32  ;;  %1915 = vmatpush3.bf16.msra.mxu1 %v2464_v46 }
 0x254   : > { %1219 = vmatprep.subr.bf16.mxu0 %v2406_v33  ;;  %1916 = vmatprep.subr.bf16.mxu1 %v2988_v18 }
 0x255   : > { %v2086_v29 = vpop.eup %2085 }
 0x256   : > { %v1080_v25 = vmul.f32 %v2086_v29, %v1061_v12  ;;  %v1720_v12 = vld [vmem:[%s2213_s7 + $0x38] sm:$0xff] }
 0x257   : > { %1220 = vmatpush1.bf16.msra.mxu0 %v2428_v38  ;;  %1917 = vmatpush3.bf16.msra.mxu1 %v2487_v51 }
 0x258   : > { %v1081_v49 = vadd.f32 %v1716_v30, %v1080_v25  ;;  %1221 = vmatprep.subr.bf16.mxu0 %v2435_v39  ;;  %1918 = vmatprep.subr.bf16.mxu1 %v2988_v18 }
 0x25a   : > { %2087 = vtanh.f32 %v1081_v49 }
 0x25b   : > { %1222 = vmatpush1.bf16.msra.mxu0 %v2451_v43  ;;  %1919 = vmatpush3.bf16.msra.mxu1 %v2508_v55  ;;  %2089 = vrcp.f32 %v1077_v31 }
 0x25c   : > { %1223 = vmatprep.subr.bf16.mxu0 %v2458_v45  ;;  %1920 = vmatprep.subr.bf16.mxu1 %v2988_v18 }
 0x25f   : > { %1224 = vmatpush1.bf16.msra.mxu0 %v2474_v48  ;;  %1921 = vmatpush3.bf16.msra.mxu1 %v2527_v58 }
 0x260   : > { %1225 = vmatprep.subr.bf16.mxu0 %v2481_v50  ;;  %1922 = vmatprep.subr.bf16.mxu1 %v2988_v18 }
 0x263   : > { %1226 = vmatpush1.bf16.msra.mxu0 %v2495_v52  ;;  %1923 = vmatpush3.bf16.msra.mxu1 %v2543_v61 }
 0x264   : > { %v2088_v32 = vpop.eup %2087  ;;  %1227 = vmatprep.subr.bf16.mxu0 %v2502_v54  ;;  %1924 = vmatprep.subr.bf16.mxu1 %v2988_v18 }
 0x265   : > { %v1083_v33 = vsub.f32 %v2689_v35, %v2088_v32  ;;  %v2090_v38 = vpop.eup %2089 }
 0x267   : > { %v1084_v39 = vmul.f32 %v2090_v38, %v1083_v33  ;;  %1228 = vmatpush1.bf16.msra.mxu0 %v2515_v56  ;;  %1925 = vmatpush3.bf16.msra.mxu1 %v2553_v63 }
 0x268   : > { %1229 = vmatprep.subr.bf16.mxu0 %v2521_v57  ;;  %1926 = vmatprep.subr.bf16.mxu1 %v2988_v18 }
 0x269   : > { %v1085_v34 = vadd.f32 %v2088_v32, %v1084_v39  ;;  %v3005_v32 = vld [vmem:[#allocation15_spill] sm:$0xff]  ;;  %v1721_v39 = vld [vmem:[%s2213_s7 + $0x40] sm:$0xff] }
 0x26b   : > { %v2781_v53 = vsel %vm1100_vm12, %v1085_v34, %v2689_v35  ;;  %1230 = vmatpush1.bf16.msra.mxu0 %v2534_v59  ;;  %1927 = vmatpush3.bf16.msra.mxu1 %v2563_v0  ;;  %v2132_v35 = vld [vmem:[%s2944_s3] ss:$12 sps:$4 sm:$0xff]   ;;  %v1724_v34 = vld [vmem:[%s2218_s10 + $0x18] sm:$0xff] }
 0x26c   : > { %v1214_v1 = vpack.c.bf16 %v2781_v53, %v2781_v53  ;;  %1339 = vmatprep.subr.bf16.mxu0 %v2131_v60  ;;  %1932 = vmatprep.subr.bf16.mxu1 %v2988_v18 }
 0x26e   : > { %1248 = vmatmul.mubr.bf16.vlgmr.msra.gmra.mrb[20].mxu0 %v1214_v1  ;;  %1929 = vmatmul.mubr.bf16.vlgmr.msra.gmra.mrb[20].mxu1 %v1214_v1 }
 0x26f   : > { %1340 = vmatpush1.bf16.msra.mxu0 %v2132_v35  ;;  %1933 = vmatpush3.bf16.msra.mxu1 %v2133_v36 }
 0x270   : > { %1341 = vmatprep.subr.bf16.mxu0 %v2134_v4  ;;  %1934 = vmatprep.subr.bf16.mxu1 %v2988_v18 }
 0x271   : > { %1371 = vmatprep.mubr.bf16.mxu0 %v2989_v24  ;;  %1948 = vmatprep.mubr.msk.bf16.mxu1 %vm2158_vm0, %v2988_v18 }
 0x273   : > { %1342 = vmatpush1.bf16.msra.mxu0 %v2135_v15  ;;  %1935 = vmatpush3.bf16.msra.mxu1 %v2294_v14  ;;  %v2139_v14 = vld [vmem:[%s2944_s3 + $0x48] ss:$12 sps:$4 sm:$0xff]  }
 0x274   : > { %1343 = vmatprep.subr.bf16.mxu0 %v2136_v13  ;;  %1936 = vmatprep.subr.bf16.mxu1 %v2988_v18 }
 0x277   : > { %1344 = vmatpush1.bf16.msra.mxu0 %v2137_v47  ;;  %1937 = vmatpush3.bf16.msra.mxu1 %v2313_v17  ;;  %v2141_v17 = vld [vmem:[%s2944_s3 + $0x60] ss:$12 sps:$4 sm:$0xff]  }
 0x278   : > { %1345 = vmatprep.subr.bf16.mxu0 %v2138_v41  ;;  %1938 = vmatprep.subr.bf16.mxu1 %v2988_v18 }
 0x27b   : > { %1346 = vmatpush1.bf16.msra.mxu0 %v2139_v14  ;;  %1939 = vmatpush3.bf16.msra.mxu1 %v2332_v20  ;;  %v1719_v20 = vld [vmem:[%s2213_s7 + $0x30] sm:$0xff] }
 0x27c   : > { %1347 = vmatprep.subr.bf16.mxu0 %v2140_v27  ;;  %1940 = vmatprep.subr.bf16.mxu1 %v2988_v18 }
 0x27f   : > { %1348 = vmatpush1.bf16.msra.mxu0 %v2141_v17  ;;  %1941 = vmatpush3.bf16.msra.mxu1 %v2351_v23 }
 0x280   : > { %1349 = vmatprep.subr.bf16.mxu0 %v2307_v16  ;;  %1942 = vmatprep.subr.bf16.mxu1 %v2988_v18  ;;  %v3002_v16 = vld [vmem:[#allocation9_spill] sm:$0xff] }
 0x283   : > { %1350 = vmatpush1.bf16.msra.mxu0 %v2990_v2  ;;  %1943 = vmatpush3.bf16.msra.mxu1 %v2991_v3  ;;  %v3003_v3 = vld [vmem:[#allocation13_spill] sm:$0xff] }
 0x284   : > { %1351 = vmatprep.subr.bf16.mxu0 %v2992_v6  ;;  %1944 = vmatprep.subr.bf16.mxu1 %v2988_v18 }
 0x287   : > { %1352 = vmatpush1.bf16.msra.mxu0 %v2993_v7  ;;  %1945 = vmatpush3.bf16.msra.mxu1 %v2994_v8 }
 0x288   : > { %1353 = vmatprep.subr.bf16.mxu0 %v2995_v9  ;;  %1946 = vmatprep.subr.bf16.mxu1 %v2988_v18 }
 0x28b   : > { %1354 = vmatpush1.bf16.msra.mxu0 %v2996_v10  ;;  %1947 = vmatpush3.bf16.msra.mxu1 %v2997_v11 }
 0x28c   : > { %1444 = vmatprep.subr.bf16.mxu0 %v3002_v16  ;;  %1952 = vmatprep.subr.bf16.mxu1 %v2988_v18 }
 0x321   : > { %v1143_v23 = vpop.f32.mrb[16].mxu0  ;;  %v1184_v2 = vpop.f32.mrb[16].mxu1 }
 0x322   : > { %v1144_v6 = vadd.f32 %v1143_v23, %v3003_v3  ;;  %v1145_v7 = vpop.f32.mrb[17].mxu0  ;;  %v1910_v8 = vpop.f32.mrb[17].mxu1  ;;  %v1185_v33 = vadd.f32 %v1184_v2, %v3005_v32  ;;  %v1725_v23 = vld [vmem:[%s2218_s10 + $0x20] sm:$0xff] }
 0x323   : > { %v1147_v44 = vpop.f32.mrb[18].mxu0  ;;  %v1187_v9 = vpop.f32.mrb[18].mxu1  ;;  %v1146_v28 = vadd.f32 %v1145_v7, %v3004_v19 }
 0x324   : > { %v1190_v62 = vadd.f32 %v1719_v20, %v1144_v6  ;;  %v1148_v22 = vpop.f32.mrb[19].mxu0  ;;  %v1911_v10 = vpop.f32.mrb[19].mxu1 }
 0x325   : > { %v1197_v29 = vadd.f32 %v1720_v12, %v1146_v28  ;;  %v1321_v22 = vpop.permute.xlu0 %1320 }
 0x326   : > { %v1722_v11 = vmul.f32 -1.442695, %v1190_v62  ;;  %vm1322_vm13 = vcmp.eq.s32.totalorder %v1321_v22, 1 }
 0x327   : > { %v1723_v30 = vmul.f32 -1.442695, %v1197_v29  ;;  %v2142_v29 = vld [vmem:[%s2944_s3 + $0xc0] ss:$12 sps:$4 sm:$0xff]  }
 0x328   : > { %2091 = vpow2.f32 %v1722_v11 }
 0x329   : > { %2093 = vpow2.f32 %v1723_v30  ;;  %v2143_v30 = vld [vmem:[%s2944_s3 + $0xdc] ss:$12 sps:$4 sm:$0xff]  }
 0x332   : > { %v2092_v25 = vpop.eup %2091 }
 0x333   : > { %v1194_v49 = vadd.f32 1.0, %v2092_v25  ;;  %v2094_v31 = vpop.eup %2093 }
 0x334   : > { %v1201_v36 = vadd.f32 1.0, %v2094_v31  ;;  %v1726_v31 = vld [vmem:[%s2218_s10 + $0x28] sm:$0xff] }
 0x335   : > { %2095 = vrcp.f32 %v1194_v49  ;;  %v2145_v49 = vld [vmem:[%s2944_s3 + $0xf4] ss:$12 sps:$4 sm:$0xff]  }
 0x33f   : > { %v2096_v38 = vpop.eup %2095 }
 0x340   : > { %v1204_v42 = vmul.f32 %v2096_v38, %v1185_v33  ;;  %v2146_v38 = vld [vmem:[%s2944_s3 + $0xf0] ss:$12 sps:$4 sm:$0xff]  }
 0x341   : > { %v1249_v1 = vpop.f32.mrb[20].mxu0  ;;  %v1290_v60 = vpop.f32.mrb[20].mxu1 }
 0x342   : > { %v1205_v35 = vadd.f32 %v1721_v39, %v1204_v42  ;;  %v1250_v4 = vadd.f32 %v1249_v1, %v2635_v26  ;;  %v1251_v15 = vpop.f32.mrb[21].mxu0  ;;  %v1930_v13 = vpop.f32.mrb[21].mxu1  ;;  %v1291_v25 = vadd.f32 %v1290_v60, %v2650_v5  ;;  %v2147_v42 = vld [vmem:[%s2944_s3 + $0x10c] ss:$12 sps:$4 sm:$0xff]  }
 0x343   : > { %v1253_v47 = vpop.f32.mrb[22].mxu0  ;;  %v1293_v41 = vpop.f32.mrb[22].mxu1  ;;  %v1252_v20 = vadd.f32 %v1251_v15, %v2640_v37 }
 0x344   : > { %2097 = vtanh.f32 %v1205_v35  ;;  %v1296_v14 = vadd.f32 %v1724_v34, %v1250_v4  ;;  %v1254_v27 = vpop.f32.mrb[23].mxu0  ;;  %v1931_v17 = vpop.f32.mrb[23].mxu1 }
 0x345   : > { %2099 = vrcp.f32 %v1201_v36  ;;  %v1303_v2 = vadd.f32 %v1725_v23, %v1252_v20  ;;  %v1730_v36 = vld [vmem:[%s2213_s7 + $0x50] sm:$0xff]  ;;  %v1731_v27 = vld [vmem:[%s2213_s7 + $0x58] sm:$0xff] }
 0x346   : > { %v1727_v16 = vmul.f32 -1.442695, %v1296_v14 }
 0x347   : > { %v1728_v44 = vmul.f32 -1.442695, %v1303_v2 }
 0x348   : > { %2101 = vpow2.f32 %v1727_v16  ;;  %v1440_v16 = vld [vmem:[%s2218_s10] sm:$0xff] }
 0x349   : > { %2103 = vpow2.f32 %v1728_v44 }
 0x34e   : > { %v2098_v6 = vpop.eup %2097 }
 0x34f   : > { %v1207_v7 = vsub.f32 %v2742_v21, %v2098_v6  ;;  %v2100_v8 = vpop.eup %2099 }
 0x351   : > { %v1208_v9 = vmul.f32 %v2100_v8, %v1207_v7 }
 0x352   : > { %v2102_v62 = vpop.eup %2101 }
 0x353   : > { %v1300_v10 = vadd.f32 1.0, %v2102_v62  ;;  %v1209_v11 = vadd.f32 %v2098_v6, %v1208_v9 }
 0x355   : > { %2105 = vrcp.f32 %v1300_v10  ;;  %v2858_v28 = vsel %vm1322_vm13, %v1209_v11, %v2742_v21  ;;  %v2144_v21 = vld [vmem:[%s2944_s3 + $0xd8] ss:$12 sps:$4 sm:$0xff]  }
 0x356   : > { %v1338_v12 = vpack.c.bf16 %v2858_v28, %v2858_v28 }
 0x358   : > { %1372 = vmatmul.mubr.bf16.vlgmr.msra.gmra.mrb[24].mxu0 %v1338_v12  ;;  %1949 = vmatmul.mubr.bf16.vlgmr.msra.gmra.mrb[24].mxu1 %v1338_v12  ;;  %v1441_v12 = vld [vmem:[%s2218_s10 + $0x8] sm:$0xff] }
 0x359   : > { %1445 = vmatpush1.bf16.msra.mxu0 %v2142_v29  ;;  %1953 = vmatpush3.bf16.msra.mxu1 %v2441_v40  ;;  %v2104_v40 = vpop.eup %2103 }
 0x35a   : > { %1446 = vmatprep.subr.bf16.mxu0 %v2143_v30  ;;  %1954 = vmatprep.subr.bf16.mxu1 %v2988_v18  ;;  %v1307_v39 = vadd.f32 1.0, %v2104_v40 }
 0x35b   : > { %1476 = vmatprep.mubr.bf16.mxu0 %v2989_v24  ;;  %1968 = vmatprep.mubr.msk.bf16.mxu1 %vm2158_vm0, %v2988_v18 }
 0x35d   : > { %1447 = vmatpush1.bf16.msra.mxu0 %v2144_v21  ;;  %1955 = vmatpush3.bf16.msra.mxu1 %v2464_v46 }
 0x35e   : > { %1448 = vmatprep.subr.bf16.mxu0 %v2145_v49  ;;  %1956 = vmatprep.subr.bf16.mxu1 %v2988_v18 }
 0x35f   : > { %v2106_v24 = vpop.eup %2105 }
 0x360   : > { %v1310_v33 = vmul.f32 %v2106_v24, %v1291_v25  ;;  %v1550_v25 = vpop.permute.xlu0 %1549 }
 0x361   : > { %1449 = vmatpush1.bf16.msra.mxu0 %v2146_v38  ;;  %1957 = vmatpush3.bf16.msra.mxu1 %v2487_v51  ;;  %vm1551_vm15 = vcmp.eq.s32.totalorder %v1550_v25, 1 }
 0x362   : > { %v1311_v46 = vadd.f32 %v1726_v31, %v1310_v33  ;;  %1450 = vmatprep.subr.bf16.mxu0 %v2147_v42  ;;  %1958 = vmatprep.subr.bf16.mxu1 %v2988_v18  ;;  %v1442_v42 = vld [vmem:[%s2218_s10 + $0x10] sm:$0xff] }
 0x364   : > { %2107 = vtanh.f32 %v1311_v46 }
 0x365   : > { %1451 = vmatpush1.bf16.msra.mxu0 %v2451_v43  ;;  %1959 = vmatpush3.bf16.msra.mxu1 %v2508_v55  ;;  %2109 = vrcp.f32 %v1307_v39 }
 0x366   : > { %1452 = vmatprep.subr.bf16.mxu0 %v2458_v45  ;;  %1960 = vmatprep.subr.bf16.mxu1 %v2988_v18 }
 0x369   : > { %1453 = vmatpush1.bf16.msra.mxu0 %v2474_v48  ;;  %1961 = vmatpush3.bf16.msra.mxu1 %v2527_v58 }
 0x36a   : > { %1454 = vmatprep.subr.bf16.mxu0 %v2481_v50  ;;  %1962 = vmatprep.subr.bf16.mxu1 %v2988_v18  ;;  %v1329_v50 = vpop.permute.xlu1 %1328 }
 0x36b   : > { %vm1330_vm14 = vcmp.eq.s32.totalorder %v1329_v50, 1 }
 0x36d   : > { %1455 = vmatpush1.bf16.msra.mxu0 %v2495_v52  ;;  %1963 = vmatpush3.bf16.msra.mxu1 %v2543_v61 }
 0x36e   : > { %v2108_v43 = vpop.eup %2107  ;;  %1456 = vmatprep.subr.bf16.mxu0 %v2502_v54  ;;  %1964 = vmatprep.subr.bf16.mxu1 %v2988_v18 }
 0x36f   : > { %v1313_v45 = vsub.f32 %v2781_v53, %v2108_v43  ;;  %v2110_v51 = vpop.eup %2109 }
 0x371   : > { %1457 = vmatpush1.bf16.msra.mxu0 %v2515_v56  ;;  %1965 = vmatpush3.bf16.msra.mxu1 %v2553_v63  ;;  %v1314_v48 = vmul.f32 %v2110_v51, %v1313_v45  ;;  %v1729_v56 = vld [vmem:[%s2213_s7 + $0x48] sm:$0xff] }
 0x372   : > { %1458 = vmatprep.subr.bf16.mxu0 %v2521_v57  ;;  %1966 = vmatprep.subr.bf16.mxu1 %v2988_v18 }
 0x373   : > { %v1315_v52 = vadd.f32 %v2108_v43, %v1314_v48 }
 0x375   : > { %1459 = vmatpush1.bf16.msra.mxu0 %v2534_v59  ;;  %1967 = vmatpush3.bf16.msra.mxu1 %v2563_v0  ;;  %v2911_v54 = vsel %vm1330_vm14, %v1315_v52, %v2781_v53 }
 0x376   : > { %v1443_v55 = vpack.c.bf16 %v2911_v54, %v2911_v54 }
 0x378   : > { %1477 = vmatmul.mubr.bf16.vlgmr.msra.gmra.mrb[28].mxu0 %v1443_v55  ;;  %1969 = vmatmul.mubr.bf16.vlgmr.msra.gmra.mrb[28].mxu1 %v1443_v55  ;;  %v1558_v55 = vpop.permute.xlu1 %1557 }
 0x379   : > { %vm1559_vm0 = vcmp.eq.s32.totalorder %v1558_v55, 1 }
 0x42b   : > { %v1373_v57 = vpop.f32.mrb[24].mxu0  ;;  %v1414_v58 = vpop.f32.mrb[24].mxu1 }
 0x42c   : > { %v1374_v61 = vadd.f32 %v1373_v57, %v3003_v3  ;;  %v1375_v63 = vpop.f32.mrb[25].mxu0  ;;  %v1950_v18 = vpop.f32.mrb[25].mxu1  ;;  %v1415_v41 = vadd.f32 %v1414_v58, %v3005_v32 }
 0x42d   : > { %v1377_v34 = vpop.f32.mrb[26].mxu0  ;;  %v1417_v59 = vpop.f32.mrb[26].mxu1  ;;  %v1376_v35 = vadd.f32 %v1375_v63, %v3004_v19 }
 0x42e   : > { %v1420_v1 = vadd.f32 %v1729_v56, %v1374_v61  ;;  %v1378_v0 = vpop.f32.mrb[27].mxu0  ;;  %v1951_v53 = vpop.f32.mrb[27].mxu1 }
 0x42f   : > { %v1427_v4 = vadd.f32 %v1730_v36, %v1376_v35 }
 0x430   : > { %v1732_v60 = vmul.f32 -1.442695, %v1420_v1 }
 0x431   : > { %v1733_v15 = vmul.f32 -1.442695, %v1427_v4 }
 0x432   : > { %2111 = vpow2.f32 %v1732_v60 }
 0x433   : > { %2113 = vpow2.f32 %v1733_v15 }
 0x43c   : > { %v2112_v13 = vpop.eup %2111 }
 0x43d   : > { %v1424_v47 = vadd.f32 1.0, %v2112_v13  ;;  %v2114_v3 = vpop.eup %2113 }
 0x43e   : > { %v1431_v6 = vadd.f32 1.0, %v2114_v3 }
 0x43f   : > { %2115 = vrcp.f32 %v1424_v47 }
 0x449   : > { %v2116_v14 = vpop.eup %2115 }
 0x44a   : > { %v1434_v17 = vmul.f32 %v2116_v14, %v1415_v41 }
 0x44b   : > { %v1478_v20 = vpop.f32.mrb[28].mxu0  ;;  %v1519_v23 = vpop.f32.mrb[28].mxu1 }
 0x44c   : > { %v1435_v2 = vadd.f32 %v1731_v27, %v1434_v17  ;;  %v1479_v19 = vadd.f32 %v1478_v20, %v2635_v26  ;;  %v1480_v7 = vpop.f32.mrb[29].mxu0  ;;  %v1970_v8 = vpop.f32.mrb[29].mxu1  ;;  %v1520_v46 = vadd.f32 %v1519_v23, %v2650_v5 }
 0x44d   : > { %v1482_v44 = vpop.f32.mrb[30].mxu0  ;;  %v1522_v9 = vpop.f32.mrb[30].mxu1  ;;  %v1481_v11 = vadd.f32 %v1480_v7, %v2640_v37 }
 0x44e   : > { %2117 = vtanh.f32 %v1435_v2  ;;  %v1525_v62 = vadd.f32 %v1479_v19, %v1440_v16  ;;  %v1483_v22 = vpop.f32.mrb[31].mxu0  ;;  %v1971_v10 = vpop.f32.mrb[31].mxu1 }
 0x44f   : > { %2119 = vrcp.f32 %v1431_v6  ;;  %v1532_v29 = vadd.f32 %v1481_v11, %v1441_v12 }
 0x450   : > { %v1734_v32 = vmul.f32 -1.442695, %v1525_v62 }
 0x451   : > { %v1735_v40 = vmul.f32 -1.442695, %v1532_v29 }
 0x452   : > { %2121 = vpow2.f32 %v1734_v32 }
 0x453   : > { %2123 = vpow2.f32 %v1735_v40 }
 0x458   : > { %v2118_v30 = vpop.eup %2117 }
 0x459   : > { %v1437_v21 = vsub.f32 %v2858_v28, %v2118_v30  ;;  %v2120_v26 = vpop.eup %2119 }
 0x45b   : > { %v1438_v49 = vmul.f32 %v2120_v26, %v1437_v21 }
 0x45c   : > { %v2122_v24 = vpop.eup %2121 }
 0x45d   : > { %v1439_v31 = vadd.f32 %v2118_v30, %v1438_v49  ;;  %v1529_v33 = vadd.f32 1.0, %v2122_v24  ;;  %v2124_v37 = vpop.eup %2123 }
 0x45e   : > { %v1536_v51 = vadd.f32 1.0, %v2124_v37 }
 0x45f   : > { %v1552_v38 = vsel %vm1551_vm15, %v1439_v31, %v2858_v28  ;;  %2125 = vrcp.f32 %v1529_v33 }
 0x460   : > { %1561 = vst [vmem:[#allocation2] sm:$0xff] %v1552_v38  ;;  %1737 = vst [vmem:[%s2947_s6 + $0x8] sm:$0xff] (!%p1736_p6), %v1552_v38 }
 0x469   : > { %v2126_v39 = vpop.eup %2125 }
 0x46a   : > { %v1539_v43 = vmul.f32 %v2126_v39, %v1520_v46 }
 0x46c   : > { %v1540_v45 = vadd.f32 %v1539_v43, %v1442_v42 }
 0x46e   : > { %2127 = vtanh.f32 %v1540_v45 }
 0x46f   : > { %2129 = vrcp.f32 %v1536_v51 }
 0x478   : > { %v2128_v48 = vpop.eup %2127 }
 0x479   : > { %v1542_v50 = vsub.f32 %v2911_v54, %v2128_v48  ;;  %v2130_v52 = vpop.eup %2129 }
 0x47a   : > { %1566 = sbr.rel (%p1736_p6) target bundleno = 1153 (0x481), region = 52 }
 0x47b   : > { %v1543_v56 = vmul.f32 %v2130_v52, %v1542_v50 }
 0x47d   : > { %v1544_v57 = vadd.f32 %v2128_v48, %v1543_v56 }
 0x47f   : > { %v1560_v28 = vsel %vm1559_vm0, %v1544_v57, %v2911_v54 }
 0x480   : > { %1562 = vst [vmem:[#allocation3] sm:$0xff] %v1560_v28  ;;  %1567 = vst [vmem:[%s2947_s6] sm:$0xff] (!%p1736_p6), %v1560_v28 }
 0x481 PF: > { %s16_s21 = sadd.s32 1, %s2154_s21  }
 0x482   : > { %p13_p7 = scmp.ge.s32.totalorder %s16_s21, 5  }
 0x484   :  { %15 = sbr.rel (!%p13_p7) target bundleno = 1 (0x1), region = 91 }

</bundles_post_ra>
